<compile_context>
chip_gen: v5e
topology: v5e:2x2
jax: 0.10.0
libtpu: 0.0.40
codegen_flags: <defaults>
</compile_context>

<pallas_src>
import functools

import numpy as np
import jax
import jax.numpy as jnp
from jax.experimental import pallas as pl
from jax.experimental.pallas import tpu as pltpu

_TM_MAX = 512          # GEMM activation rows per grid step (resident-W path)
_TAP_BM_MAX = 1024     # flat-tap conv output rows per grid step
_RES_W_BYTES = 8 * 2**20   # weight fully VMEM-resident in the GEMM below this


def _round_up(x, m):
    return (x + m - 1) // m * m


def _cdiv(a, b):
    return -(-a // b)


@functools.lru_cache(maxsize=None)
def _vmem_caps():
    """Returns (physical VMEM estimate, per-kernel vmem_limit_bytes)."""
    cap = None
    try:
        cap = int(pltpu.get_tpu_info().vmem_capacity_bytes)
    except Exception:
        cap = None
    if not cap:
        try:
            kind = jax.devices()[0].device_kind.lower()
        except Exception:
            kind = ""
        if any(t in kind for t in ("v4", "v5", "v6")):
            cap = 128 * 2**20
        else:                      # v7x (64 MiB / TensorCore) or unknown
            cap = 64 * 2**20
    limit = min(int(cap * 0.8), 100 * 2**20)
    return cap, limit


def _vmem_limit():
    return _vmem_caps()[1]


def _tap_weight_budget():
    # Allowed per-K-block weight footprint in the tap conv (double-buffered
    # by the auto-pipeliner): 20 MiB on 128-MiB parts, ~10 MiB on v7x.
    return _vmem_caps()[1] // 5


# ---------------------------------------------------------------------------
# Weight-resident fused GEMM: grid over M tiles only, the (K, N) weight block
# has a constant index so it is DMA'd once and stays in VMEM.  Epilogue fuses
# per-column scale/bias (folded BN), optional residual add and ReLU.
# ---------------------------------------------------------------------------
def _mm_res_kernel(*refs, relu, has_res, has_scale):
    idx = 0
    a_ref = refs[idx]; idx += 1
    b_ref = refs[idx]; idx += 1
    s_ref = c_ref = r_ref = None
    if has_scale:
        s_ref = refs[idx]; idx += 1
        c_ref = refs[idx]; idx += 1
    if has_res:
        r_ref = refs[idx]; idx += 1
    o_ref = refs[idx]

    out = jnp.dot(a_ref[...], b_ref[...], preferred_element_type=jnp.float32)
    if has_scale:
        out = out * s_ref[...] + c_ref[...]
    if r_ref is not None:
        out = out + r_ref[...].astype(jnp.float32)
    if relu:
        out = jnp.maximum(out, 0.0)
    o_ref[...] = out.astype(o_ref.dtype)


@functools.lru_cache(maxsize=None)
def _build_mm_resident(Mp, K, N, tm, relu, has_res, has_scale, out_dtype):
    in_specs = [pl.BlockSpec((tm, K), lambda i: (i, 0)),
                pl.BlockSpec((K, N), lambda i: (0, 0))]
    if has_scale:
        in_specs += [pl.BlockSpec((1, N), lambda i: (0, 0)),
                     pl.BlockSpec((1, N), lambda i: (0, 0))]
    if has_res:
        in_specs.append(pl.BlockSpec((tm, N), lambda i: (i, 0)))
    return pl.pallas_call(
        functools.partial(_mm_res_kernel, relu=relu, has_res=has_res,
                          has_scale=has_scale),
        out_shape=jax.ShapeDtypeStruct((Mp, N), out_dtype),
        grid_spec=pltpu.PrefetchScalarGridSpec(
            num_scalar_prefetch=0,
            grid=(Mp // tm,),
            in_specs=in_specs,
            out_specs=pl.BlockSpec((tm, N), lambda i: (i, 0))),
        compiler_params=pltpu.CompilerParams(
            dimension_semantics=("parallel",),
            vmem_limit_bytes=_vmem_limit()),
    )


# ---------------------------------------------------------------------------
# Fallback tiled GEMM (only used when the weight cannot be VMEM-resident,
# e.g. very wide upsample GEMMs at large batch).
# ---------------------------------------------------------------------------
def _mm_kernel(*refs, relu, has_res, has_scale):
    idx = 0
    a_ref = refs[idx]; idx += 1
    b_ref = refs[idx]; idx += 1
    s_ref = c_ref = r_ref = None
    if has_scale:
        s_ref = refs[idx]; idx += 1
        c_ref = refs[idx]; idx += 1
    if has_res:
        r_ref = refs[idx]; idx += 1
    o_ref = refs[idx]; idx += 1
    acc_ref = refs[idx]

    @pl.when(pl.program_id(2) == 0)
    def _():
        acc_ref[...] = jnp.zeros_like(acc_ref)

    acc_ref[...] += jnp.dot(a_ref[...], b_ref[...],
                            preferred_element_type=jnp.float32)

    @pl.when(pl.program_id(2) == pl.num_programs(2) - 1)
    def _():
        out = acc_ref[...]
        if has_scale:
            out = out * s_ref[...] + c_ref[...]
        if r_ref is not None:
            out = out + r_ref[...].astype(jnp.float32)
        if relu:
            out = jnp.maximum(out, 0.0)
        o_ref[...] = out.astype(o_ref.dtype)


@functools.lru_cache(maxsize=None)
def _build_mm(Mp, Kp, Np, tm, tk, tn, relu, has_res, has_scale, out_dtype):
    grid = (Mp // tm, Np // tn, Kp // tk)
    in_specs = [
        pl.BlockSpec((tm, tk), lambda i, j, k: (i, k)),
        pl.BlockSpec((tk, tn), lambda i, j, k: (k, j)),
    ]
    if has_scale:
        in_specs += [pl.BlockSpec((1, tn), lambda i, j, k: (0, j)),
                     pl.BlockSpec((1, tn), lambda i, j, k: (0, j))]
    if has_res:
        in_specs.append(pl.BlockSpec((tm, tn), lambda i, j, k: (i, j)))
    return pl.pallas_call(
        functools.partial(_mm_kernel, relu=relu, has_res=has_res,
                          has_scale=has_scale),
        out_shape=jax.ShapeDtypeStruct((Mp, Np), out_dtype),
        grid_spec=pltpu.PrefetchScalarGridSpec(
            num_scalar_prefetch=0,
            grid=grid,
            in_specs=in_specs,
            out_specs=pl.BlockSpec((tm, tn), lambda i, j, k: (i, j)),
            scratch_shapes=[pltpu.VMEM((tm, tn), jnp.float32)]),
        compiler_params=pltpu.CompilerParams(
            dimension_semantics=("parallel", "parallel", "arbitrary"),
            vmem_limit_bytes=_vmem_limit()),
    )


def matmul_fused(a, b, scale=None, bias=None, *, relu=False, residual=None,
                 out_dtype=jnp.bfloat16, compute_dtype=jnp.bfloat16):
    """out = act((a @ b) [* scale + bias] [+ residual]); MXU, f32 accumulate."""
    M, K = a.shape
    _, N = b.shape
    a = a.astype(compute_dtype)
    b = b.astype(compute_dtype)
    esize = np.dtype(compute_dtype).itemsize
    has_scale = scale is not None
    has_res = residual is not None

    # ---- weight-resident path: B stays in VMEM, A/out stream exactly once.
    if K * N * esize <= _RES_W_BYTES and N <= 4096:
        tm = min(_TM_MAX, _round_up(M, 8))
        Mp = _round_up(M, tm)

        def padm(x):
            return x if x.shape[0] == Mp else jnp.pad(
                x, ((0, Mp - x.shape[0]), (0, 0)))

        args = [padm(a), b]
        if has_scale:
            args += [scale.reshape(1, N).astype(jnp.float32),
                     bias.reshape(1, N).astype(jnp.float32)]
        if has_res:
            args.append(padm(residual.astype(compute_dtype)))
        fn = _build_mm_resident(Mp, K, N, tm, bool(relu), has_res, has_scale,
                                out_dtype)
        out = fn(*args)
        return out[:M] if Mp != M else out

    # ---- fallback tiled path.
    tm = min(_TM_MAX, _round_up(M, 8))
    if K < 128:
        tk = K
    else:
        tk = 128
        for cand in (512, 384, 256, 128):
            if K % cand == 0:
                tk = cand
                break
    if N < 128:
        tn = N
    else:
        tn = 128
        for cand in (512, 256, 128):
            if N % cand == 0:
                tn = cand
                break
    Mp, Kp, Np = _round_up(M, tm), _round_up(K, tk), _round_up(N, tn)

    def pad2(x, r, c):
        if x.shape == (r, c):
            return x
        return jnp.pad(x, ((0, r - x.shape[0]), (0, c - x.shape[1])))

    args = [pad2(a, Mp, Kp), pad2(b, Kp, Np)]
    if has_scale:
        args.append(pad2(scale.reshape(1, N).astype(jnp.float32), 1, Np))
        args.append(pad2(bias.reshape(1, N).astype(jnp.float32), 1, Np))
    if has_res:
        args.append(pad2(residual.astype(compute_dtype), Mp, Np))
    fn = _build_mm(Mp, Kp, Np, tm, tk, tn, bool(relu), has_res, has_scale,
                   out_dtype)
    out = fn(*args)
    if (Mp, Np) != (M, N):
        out = out[:M, :N]
    return out


# ---------------------------------------------------------------------------
# Flat-tap stride-1 conv.  The spatially padded activation stays in HBM
# (memory_space=ANY); each grid step DMAs ONE superset window of
# (bm + max_tap_offset) rows and the kh*kw taps are shifted in-VMEM slices.
# The next step's window (same image) is prefetched into the other buffer.
# ---------------------------------------------------------------------------
def _tap_conv_kernel(x_hbm, w_ref, s_ref, c_ref, o_ref,
                     acc_ref, a_buf, sem, *,
                     tap_offsets, relu, bm, ck, win, num_m, num_k):
    n = pl.program_id(0)
    mb = pl.program_id(1)
    kb = pl.program_id(2)
    lstep = mb * num_k + kb            # local step within this image
    nsteps = num_m * num_k
    slot = lstep % 2

    def dma(m_idx, k_idx, slot_idx):
        return pltpu.make_async_copy(
            x_hbm.at[n, pl.ds(m_idx * bm, win), pl.ds(k_idx * ck, ck)],
            a_buf.at[slot_idx], sem.at[slot_idx])

    @pl.when(lstep == 0)
    def _():
        dma(0, 0, 0).start()           # cold start for this image

    @pl.when(lstep + 1 < nsteps)
    def _():
        nstep = lstep + 1
        dma(nstep // num_k, nstep % num_k, 1 - slot).start()

    dma(mb, kb, slot).wait()

    @pl.when(kb == 0)
    def _():
        acc_ref[...] = jnp.zeros_like(acc_ref)

    cur = a_buf.at[slot]
    for t, off in enumerate(tap_offsets):
        acc_ref[...] += jnp.dot(cur[pl.ds(off, bm), :], w_ref[t],
                                preferred_element_type=jnp.float32)

    @pl.when(kb == num_k - 1)
    def _():
        out = acc_ref[...] * s_ref[...] + c_ref[...]
        if relu:
            out = jnp.maximum(out, 0.0)
        o_ref[0] = out.astype(o_ref.dtype)


@functools.lru_cache(maxsize=None)
def _build_tap_conv(N, Mp, L, Cin, Cout, bm, ck, win, tap_offsets, relu):
    ntap = len(tap_offsets)
    num_m = Mp // bm
    num_k = Cin // ck
    kern = functools.partial(_tap_conv_kernel, tap_offsets=tap_offsets,
                             relu=relu, bm=bm, ck=ck, win=win,
                             num_m=num_m, num_k=num_k)
    return pl.pallas_call(
        kern,
        out_shape=jax.ShapeDtypeStruct((N, Mp, Cout), jnp.bfloat16),
        grid_spec=pltpu.PrefetchScalarGridSpec(
            num_scalar_prefetch=0,
            grid=(N, num_m, num_k),
            in_specs=[
                pl.BlockSpec(memory_space=pl.ANY),            # activation, HBM
                pl.BlockSpec((ntap, ck, Cout), lambda n, m, k: (0, k, 0)),
                pl.BlockSpec((1, Cout), lambda n, m, k: (0, 0)),
                pl.BlockSpec((1, Cout), lambda n, m, k: (0, 0)),
            ],
            out_specs=pl.BlockSpec((1, bm, Cout), lambda n, m, k: (n, m, 0)),
            scratch_shapes=[
                pltpu.VMEM((bm, Cout), jnp.float32),        # accumulator
                pltpu.VMEM((2, win, ck), jnp.bfloat16),     # window dbl-buffer
                pltpu.SemaphoreType.DMA((2,)),
            ]),
        compiler_params=pltpu.CompilerParams(
            # n is megacore-parallel; m/k carry the manual DMA prefetch chain
            # so they stay sequential on a core.
            dimension_semantics=("parallel", "arbitrary", "arbitrary"),
            vmem_limit_bytes=_vmem_limit()),
    )


def conv_tap_s1(x, w, scale, bias, *, dilation, relu):
    """Stride-1 kxk conv + folded BN (+ReLU), no im2col materialization.

    The padded activation is flattened row-major to (N, L, Cin); output pixel
    m = ho*Wq + wo reads input rows m + (i*d)*Wq + j*d per tap (i,j).
    Columns wo >= W of each output row are garbage and stripped afterwards.
    """
    N, H, W, Cin = x.shape
    kh, kw, _, Cout = w.shape
    assert Cout <= 512, "tap conv keeps the whole Cout as one lane block"
    d = dilation
    pad = d * (kh - 1) // 2
    Wq = W + 2 * pad
    M = H * Wq
    tap_offsets = tuple(int(i * d * Wq + j * d)
                        for i in range(kh) for j in range(kw))
    maxoff = max(tap_offsets)

    nblk = max(1, _cdiv(M, _TAP_BM_MAX))
    bm = _round_up(_cdiv(M, nblk), 8)
    Mp = _round_up(M, bm)
    win = bm + maxoff

    # One jnp.pad provides both the conv halo and the flat tail so that every
    # (bm + maxoff) superset window stays in bounds.
    rows_needed = Mp + maxoff
    hp_needed = _cdiv(rows_needed, Wq)
    pad_bottom = max(pad, hp_needed - H - pad)
    xp = jnp.pad(x.astype(jnp.bfloat16),
                 ((0, 0), (pad, pad_bottom), (pad, pad), (0, 0)))
    L = (H + pad + pad_bottom) * Wq
    x_flat = xp.reshape(N, L, Cin)

    # K-block size: whole Cin unless the (ntap, ck, Cout) weight block would
    # blow the per-generation VMEM budget (only the 2048->512 FCN-head conv).
    ck = Cin
    wbudget = _tap_weight_budget()
    while ck > 128 and ck % 2 == 0 and kh * kw * ck * Cout * 2 > wbudget:
        ck //= 2
    assert Cin % ck == 0

    wt = w.reshape(kh * kw, Cin, Cout).astype(jnp.bfloat16)
    fn = _build_tap_conv(N, Mp, L, Cin, Cout, bm, ck, win, tap_offsets,
                         bool(relu))
    out = fn(x_flat, wt,
             scale.reshape(1, Cout).astype(jnp.float32),
             bias.reshape(1, Cout).astype(jnp.float32))
    return out[:, :M, :].reshape(N, H, Wq, Cout)[:, :, :W, :]


# ---------------------------------------------------------------------------
# Conv dispatcher: 1x1 -> weight-resident GEMM; stride-1 kxk -> flat-tap
# kernel; the two strided kxk convs fall back to XLA im2col + Pallas GEMM.
# ---------------------------------------------------------------------------
def conv_bn(x, w, scale, bias, *, stride=1, dilation=1, relu=True,
            residual=None, out_dtype=jnp.bfloat16):
    kh, kw, Cin, Cout = w.shape
    if kh == 1 and kw == 1:
        if stride > 1:
            x = x[:, ::stride, ::stride, :]
        N, H, W, _ = x.shape
        a = x.reshape(N * H * W, Cin)
        res = None
        if residual is not None:
            res = residual.reshape(N * H * W, Cout)
        out = matmul_fused(a, w.reshape(Cin, Cout), scale, bias, relu=relu,
                           residual=res, out_dtype=out_dtype)
        return out.reshape(N, H, W, Cout)

    if stride == 1 and Cout <= 512:
        assert residual is None
        return conv_tap_s1(x, w, scale, bias, dilation=dilation, relu=relu)

    # TODO(synk): the two strided convs (stem 7x7/s2, layer2.0 conv2 3x3/s2)
    # still use XLA im2col feeding the Pallas GEMM.
    assert residual is None
    N, H, W, _ = x.shape
    pad = dilation * (kh - 1) // 2
    Ho = (H + 2 * pad - dilation * (kh - 1) - 1) // stride + 1
    Wo = (W + 2 * pad - dilation * (kw - 1) - 1) // stride + 1
    xp = jnp.pad(x.astype(jnp.bfloat16),
                 ((0, 0), (pad, pad), (pad, pad), (0, 0)))
    cols = []
    for i in range(kh):
        for j in range(kw):
            cols.append(
                xp[:, i * dilation:i * dilation + (Ho - 1) * stride + 1:stride,
                   j * dilation:j * dilation + (Wo - 1) * stride + 1:stride, :])
    a = jnp.concatenate(cols, axis=-1).reshape(N * Ho * Wo, kh * kw * Cin)
    out = matmul_fused(a, w.reshape(kh * kw * Cin, Cout), scale, bias,
                       relu=relu, out_dtype=out_dtype)
    return out.reshape(N, Ho, Wo, Cout)


# ---------------------------------------------------------------------------
# MaxPool2d(kernel=3, stride=2, padding=1): each grid step DMAs one superset
# row-window of the padded, flattened stem output and takes the 9-tap max via
# strided in-VMEM slices.  No 9x patch materialization in HBM.
# ---------------------------------------------------------------------------
def _maxpool_kernel(x_hbm, o_ref, buf, sem, *, bho, Wp, Wo, win):
    n = pl.program_id(0)
    hb = pl.program_id(1)
    cp = pltpu.make_async_copy(
        x_hbm.at[n, pl.ds(hb * (2 * bho) * Wp, win), :], buf, sem.at[0])
    cp.start()
    cp.wait()
    for r in range(bho):
        acc = None
        for i in range(3):
            for j in range(3):
                tap = buf[pl.ds((2 * r + i) * Wp + j, Wo, stride=2), :]
                acc = tap if acc is None else jnp.maximum(acc, tap)
        o_ref[0, pl.ds(r * Wo, Wo), :] = acc


@functools.lru_cache(maxsize=None)
def _build_maxpool(N, Ho, Wo, Wp, C, bho, win):
    return pl.pallas_call(
        functools.partial(_maxpool_kernel, bho=bho, Wp=Wp, Wo=Wo, win=win),
        out_shape=jax.ShapeDtypeStruct((N, Ho * Wo, C), jnp.bfloat16),
        grid_spec=pltpu.PrefetchScalarGridSpec(
            num_scalar_prefetch=0,
            grid=(N, Ho // bho),
            in_specs=[pl.BlockSpec(memory_space=pl.ANY)],
            out_specs=pl.BlockSpec((1, bho * Wo, C), lambda n, h: (n, h, 0)),
            scratch_shapes=[pltpu.VMEM((win, C), jnp.bfloat16),
                            pltpu.SemaphoreType.DMA((1,))]),
        compiler_params=pltpu.CompilerParams(
            dimension_semantics=("parallel", "parallel"),
            vmem_limit_bytes=_vmem_limit()),
    )


def maxpool_3x3_s2_p1(x):
    N, H, W, C = x.shape
    Ho = (H - 1) // 2 + 1
    Wo = (W - 1) // 2 + 1
    Hp, Wp = H + 2, W + 2
    xp = jnp.pad(x, ((0, 0), (1, 1), (1, 1), (0, 0)),
                 constant_values=-np.inf)
    x_flat = xp.reshape(N, Hp * Wp, C)
    bho = 1
    for c in (8, 4, 2, 1):
        if Ho % c == 0:
            bho = c
            break
    win = (2 * bho + 1) * Wp
    out = _build_maxpool(N, Ho, Wo, Wp, C, bho, win)(x_flat)
    return out.reshape(N, Ho, Wo, C)


# ---------------------------------------------------------------------------
# Bilinear upsample (align_corners=False) as two f32 Pallas GEMMs.  Runs on
# the num_classes-channel logits so this stage is tiny; f32 keeps the final
# logits close to the f32 reference.
# ---------------------------------------------------------------------------
def _interp_matrix(out_size, in_size):
    scale = in_size / out_size
    i = np.arange(out_size, dtype=np.float64)
    src = np.maximum((i + 0.5) * scale - 0.5, 0.0)
    i0 = np.minimum(np.floor(src), in_size - 1).astype(np.int64)
    i1 = np.minimum(i0 + 1, in_size - 1)
    frac = src - i0
    A = np.zeros((out_size, in_size), np.float32)
    A[np.arange(out_size), i0] += (1.0 - frac)
    A[np.arange(out_size), i1] += frac
    return jnp.asarray(A)


def bilinear_upsample(x, H, W):
    N, h, w, C = x.shape
    AH = _interp_matrix(H, h)
    AW = _interp_matrix(W, w)
    t = jnp.transpose(x, (1, 0, 2, 3)).reshape(h, N * w * C).astype(jnp.float32)
    t = matmul_fused(AH, t, relu=False, out_dtype=jnp.float32,
                     compute_dtype=jnp.float32)
    t = t.reshape(H, N, w, C).transpose(2, 1, 0, 3).reshape(w, N * H * C)
    t = matmul_fused(AW, t, relu=False, out_dtype=jnp.float32,
                     compute_dtype=jnp.float32)
    return t.reshape(W, N, H, C).transpose(1, 2, 0, 3)


# ---------------------------------------------------------------------------
# Deterministic parameter construction (synthetic weights, folded BN)
# ---------------------------------------------------------------------------
_rng = np.random.default_rng(0)


def _conv_w(kh, kw, cin, cout):
    fan_in = kh * kw * cin
    w = _rng.normal(0.0, np.sqrt(2.0 / fan_in), size=(kh, kw, cin, cout))
    return jnp.asarray(w.astype(np.float32)).astype(jnp.bfloat16)


def _bn_fold(c):
    gamma = 1.0 + 0.1 * _rng.normal(size=c)
    beta = 0.1 * _rng.normal(size=c)
    mean = 0.1 * _rng.normal(size=c)
    var = 1.0 + 0.1 * np.abs(_rng.normal(size=c))
    scale = gamma / np.sqrt(var + 1e-5)
    bias = beta - mean * scale
    return (jnp.asarray(scale.astype(np.float32)),
            jnp.asarray(bias.astype(np.float32)))


def _bottleneck_params(inplanes, planes, has_downsample):
    width = planes
    p = {"w1": _conv_w(1, 1, inplanes, width)}
    p["s1"], p["b1"] = _bn_fold(width)
    p["w2"] = _conv_w(3, 3, width, width)
    p["s2"], p["b2"] = _bn_fold(width)
    p["w3"] = _conv_w(1, 1, width, planes * 4)
    p["s3"], p["b3"] = _bn_fold(planes * 4)
    if has_downsample:
        p["wd"] = _conv_w(1, 1, inplanes, planes * 4)
        p["sd"], p["bd"] = _bn_fold(planes * 4)
    return p


def init_fcn_resnet101_params(num_classes, size):
    # `size` = in_channels of the replaced classifier[4]; it must equal the
    # FCNHead hidden width (512) for the forward pass to be well-formed.
    assert size == 512, "classifier[4] in_channels must be 512 (FCNHead width)"
    params = {"conv1_w": _conv_w(7, 7, 3, 64)}
    params["conv1_s"], params["conv1_b"] = _bn_fold(64)

    # ResNet-101: blocks [3, 4, 23, 3]; layers 3/4 replace stride with dilation
    layers_cfg = [(64, 3, 1, False), (128, 4, 2, False),
                  (256, 23, 2, True), (512, 3, 2, True)]
    inplanes, dilation = 64, 1
    layers = []
    for planes, blocks, stride, dilate in layers_cfg:
        prev_dilation = dilation
        if dilate:
            dilation *= stride
            stride = 1
        has_ds = (stride != 1) or (inplanes != planes * 4)
        blk_list = [(_bottleneck_params(inplanes, planes, has_ds),
                     stride, prev_dilation)]
        inplanes = planes * 4
        for _ in range(1, blocks):
            blk_list.append((_bottleneck_params(inplanes, planes, False),
                             1, dilation))
        layers.append(blk_list)
    params["layers"] = layers

    # FCNHead(2048 -> 512) with classifier[4] replaced by Conv2d(size, ncls, 1)
    params["head_w1"] = _conv_w(3, 3, 2048, 512)
    params["head_s1"], params["head_b1"] = _bn_fold(512)
    params["head_w2"] = _conv_w(1, 1, size, num_classes)
    params["head_b2"] = jnp.asarray(
        (0.01 * _rng.normal(size=num_classes)).astype(np.float32))
    return params


# ---------------------------------------------------------------------------
# Forward pass
# ---------------------------------------------------------------------------
def _bottleneck_forward(x, p, stride, dilation):
    out = conv_bn(x, p["w1"], p["s1"], p["b1"], relu=True)
    out = conv_bn(out, p["w2"], p["s2"], p["b2"], stride=stride,
                  dilation=dilation, relu=True)
    if "wd" in p:
        identity = conv_bn(x, p["wd"], p["sd"], p["bd"], stride=stride,
                           relu=False)
    else:
        identity = x
    # conv3 + BN, residual add and final ReLU fused into the GEMM epilogue
    return conv_bn(out, p["w3"], p["s3"], p["b3"], relu=True,
                   residual=identity)


def fcn_resnet101_forward(params, x_nchw):
    H_in, W_in = x_nchw.shape[2], x_nchw.shape[3]
    x = jnp.transpose(x_nchw, (0, 2, 3, 1)).astype(jnp.bfloat16)  # NCHW->NHWC
    # ResNet-101 stem
    x = conv_bn(x, params["conv1_w"], params["conv1_s"], params["conv1_b"],
                stride=2, relu=True)
    x = maxpool_3x3_s2_p1(x)
    # layers 1-4 (output stride 8 thanks to dilation in layers 3/4)
    for layer in params["layers"]:
        for p, stride, dil in layer:
            x = _bottleneck_forward(x, p, stride, dil)
    # FCN classifier head: 3x3 conv + BN + ReLU, Dropout(identity), 1x1 conv
    x = conv_bn(x, params["head_w1"], params["head_s1"], params["head_b1"],
                relu=True)
    ncls = params["head_w2"].shape[-1]
    x = conv_bn(x, params["head_w2"], jnp.ones((ncls,), jnp.float32),
                params["head_b2"], relu=False, out_dtype=jnp.float32)
    # bilinear upsample back to the input resolution
    x = bilinear_upsample(x, H_in, W_in)
    return {"out": jnp.transpose(x, (0, 3, 1, 2))}  # back to NCHW


if __name__ == "__main__":
    num_classes, size = 5, 512
    params = init_fcn_resnet101_params(num_classes, size)
    x = jax.random.normal(jax.random.PRNGKey(0), (2, 3, 32, 32), jnp.float32)
    result = fcn_resnet101_forward(params, x)
    out = jax.block_until_ready(result["out"])
    assert out.shape == (2, num_classes, 32, 32), out.shape
    assert bool(jnp.isfinite(out).all())
    print("KERNEL_OK")
</pallas_src>

<mosaic_0001>
module attributes {stable_mosaic.version = 11 : i64} {
  func.func @_mm_res_kernel(%arg0: i32, %arg1: memref<512x147xbf16, #tpu.memory_space<vmem>>, %arg2: memref<147x64xbf16, #tpu.memory_space<vmem>>, %arg3: memref<1x64xf32, #tpu.memory_space<vmem>>, %arg4: memref<1x64xf32, #tpu.memory_space<vmem>>, %arg5: memref<512x64xbf16, #tpu.memory_space<vmem>>) attributes {dimension_semantics = [#tpu.dimension_semantics<parallel>], iteration_bounds = array<i64: 1>, scalar_prefetch = 0 : i64, scratch_operands = 0 : i64, tpu.core_type = #tpu.core_type<tc>, window_params = [{transform_indices = @transform_0, window_bounds = array<i64: 512, 147>}, {pipeline_mode = #tpu.pipeline_mode<synchronous>, transform_indices = @transform_1, window_bounds = array<i64: 147, 64>}, {pipeline_mode = #tpu.pipeline_mode<synchronous>, transform_indices = @transform_2, window_bounds = array<i64: 1, 64>}, {pipeline_mode = #tpu.pipeline_mode<synchronous>, transform_indices = @transform_3, window_bounds = array<i64: 1, 64>}, {transform_indices = @transform_4, window_bounds = array<i64: 512, 64>}]} {
    %c0 = arith.constant 0 : index
    %c0_0 = arith.constant 0 : index
    %0 = vector.load %arg1[%c0, %c0_0] : memref<512x147xbf16, #tpu.memory_space<vmem>>, vector<512x147xbf16>
    %c0_1 = arith.constant 0 : index
    %c0_2 = arith.constant 0 : index
    %1 = vector.load %arg2[%c0_1, %c0_2] : memref<147x64xbf16, #tpu.memory_space<vmem>>, vector<147x64xbf16>
    %cst = arith.constant dense<0.000000e+00> : vector<512x64xf32>
    %2 = tpu.matmul %0, %1, %cst {dimension_numbers = #tpu.dot_dimension_numbers<[1], [0], [0], [1], [0, 0, 1, 1], [], []>} : vector<512x147xbf16>, vector<147x64xbf16>, vector<512x64xf32> -> vector<512x64xf32>
    %c0_3 = arith.constant 0 : index
    %c0_4 = arith.constant 0 : index
    %3 = vector.load %arg3[%c0_3, %c0_4] : memref<1x64xf32, #tpu.memory_space<vmem>>, vector<1x64xf32>
    %4 = vector.broadcast %3 : vector<1x64xf32> to vector<512x64xf32>
    %5 = arith.mulf %2, %4 : vector<512x64xf32>
    %c0_5 = arith.constant 0 : index
    %c0_6 = arith.constant 0 : index
    %6 = vector.load %arg4[%c0_5, %c0_6] : memref<1x64xf32, #tpu.memory_space<vmem>>, vector<1x64xf32>
    %7 = vector.broadcast %6 : vector<1x64xf32> to vector<512x64xf32>
    %8 = arith.addf %5, %7 : vector<512x64xf32>
    %cst_7 = arith.constant 0.000000e+00 : f32
    %9 = vector.broadcast %cst_7 : f32 to vector<512x64xf32>
    %10 = arith.maximumf %8, %9 : vector<512x64xf32>
    %11 = arith.truncf %10 : vector<512x64xf32> to vector<512x64xbf16>
    %c0_8 = arith.constant 0 : index
    %c0_9 = arith.constant 0 : index
    %12 = vector.load %arg5[%c0_8, %c0_9] : memref<512x64xbf16, #tpu.memory_space<vmem>>, vector<512x64xbf16>
    tpu.vector_store %arg5[%c0_8, %c0_9], %11 {strides = array<i32>} : memref<512x64xbf16, #tpu.memory_space<vmem>>, vector<512x64xbf16>,
    return
  }
  func.func @transform_0(%arg0: i32) -> (i32, i32) {
    %c0_i32 = arith.constant 0 : i32
    %c0_i32_0 = arith.constant 0 : i32
    return %arg0, %c0_i32 : i32, i32
  }
  func.func @transform_1(%arg0: i32) -> (i32, i32) {
    %c0_i32 = arith.constant 0 : i32
    %c0_i32_0 = arith.constant 0 : i32
    %c0_i32_1 = arith.constant 0 : i32
    return %c0_i32, %c0_i32_0 : i32, i32
  }
  func.func @transform_2(%arg0: i32) -> (i32, i32) {
    %c0_i32 = arith.constant 0 : i32
    %c0_i32_0 = arith.constant 0 : i32
    %c0_i32_1 = arith.constant 0 : i32
    return %c0_i32, %c0_i32_0 : i32, i32
  }
  func.func @transform_3(%arg0: i32) -> (i32, i32) {
    %c0_i32 = arith.constant 0 : i32
    %c0_i32_0 = arith.constant 0 : i32
    %c0_i32_1 = arith.constant 0 : i32
    return %c0_i32, %c0_i32_0 : i32, i32
  }
  func.func @transform_4(%arg0: i32) -> (i32, i32) {
    %c0_i32 = arith.constant 0 : i32
    %c0_i32_0 = arith.constant 0 : i32
    return %arg0, %c0_i32 : i32, i32
  }
}

</mosaic_0001>

<bundles_post_ra>
// kernel: tpu_custom_call.1
= control target key start
LH: loop header
LB: loop body
LE: loop exit
PB: predicated region body
PF: predicated region fallthrough
CT: control target
= control target key end

     0   :  { %vm543_vm0 = vcmask 1040384   ;;  %vm544_vm1 = vcmask 1041408   ;;  %v1633_v2 = vmov 65535   ;;  %vm446_vm2 = vcmask 154624   ;;  %s2560_s1 = inlined_call_operand.vmem [shape: bf16[147,64], index: 1, kind: input, shape index: {}]   ;;  %s2561_s0 = inlined_call_operand.vmem [shape: bf16[512,147], index: 0, kind: input, shape index: {}]   ;;  %s2562_s2 = inlined_call_operand.vmem [shape: f32[1,64], index: 2, kind: input, shape index: {}]   ;;  %s2563_s3 = inlined_call_operand.vmem [shape: f32[1,64], index: 3, kind: input, shape index: {}]   ;;  %s2564_s4 = inlined_call_operand.vmem [shape: bf16[512,64], index: 4, kind: output, shape index: {}]  }
   0x1   :  { %v1616_v0 = vld [vmem:[%s2560_s1 + $0x38] sm:$0xff]  ;;  %v100_v1 = vld [vmem:[%s2560_s1 + $0x48] sm:$0x3]  ;;  %v545_v3 = vsel %vm543_vm0, 4294967295, %v1633_v2  ;;  %v1615_v5 = vld [vmem:[%s2560_s1 + $0x30] sm:$0xff]  ;;  %vm1152_vm3 = vcmask 519168  }
   0x2   :  { %v426_v4 = vunpack.c.l.b16 %v100_v1  ;;  %550 = vmatpush.bf16.msra.mxu0 %v1616_v0  ;;  %1618 = vmatpush.bf16.msra.mxu2 %v1616_v0  ;;  %v546_v6 = vsel %vm544_vm1, %v545_v3, 0  ;;  %v1614_v9 = vld [vmem:[%s2560_s1 + $0x28] sm:$0xff]  ;;  %v1617_v10 = vld [vmem:[%s2560_s1 + $0x40] sm:$0xff]  ;;  %v1579_v13 = vld [vmem:[%s2561_s0 + $0x114] sm:$0xf] }
   0x3   :  { %v1545_v11 = vld [vmem:[%s2561_s0 + $0x4] sm:$0xf]  ;;  %v1225_v12 = vld [vmem:[%s2561_s0 + $0x8] sm:$0xf0]  ;;  %v1361_v14 = vld [vmem:[%s2561_s0 + $0x118] sm:$0xf0] }
   0x4   :  { %v436_v7 = vpack.c.b16 %v426_v4, %v426_v4  ;;  %v1228_v15 = vor.u32 %v1545_v11, %v1225_v12  ;;  %v1613_v16 = vld [vmem:[%s2560_s1 + $0x20] sm:$0xff]  ;;  %v1364_v17 = vor.u32 %v1579_v13, %v1361_v14  ;;  %v1612_v18 = vld [vmem:[%s2560_s1 + $0x18] sm:$0xff]  ;;  %v1611_v19 = vld [vmem:[%s2560_s1 + $0x10] sm:$0xff] }
   0x5   :  { %v1610_v20 = vld [vmem:[%s2560_s1 + $0x8] sm:$0xff]  ;;  %v1547_v21 = vld [vmem:[%s2561_s0 + $0x14] sm:$0xf]  ;;  %v1233_v22 = vld [vmem:[%s2561_s0 + $0x18] sm:$0xf0] }
   0x6   :  { %v548_v8 = vand.u32 %v546_v6, %v436_v7  ;;  %551 = vmatpush.bf16.msra.mxu0 %v1615_v5  ;;  %1619 = vmatpush.bf16.msra.mxu2 %v1615_v5  ;;  %v1581_v23 = vld [vmem:[%s2561_s0 + $0x124] sm:$0xf]  ;;  %v1369_v24 = vld [vmem:[%s2561_s0 + $0x128] sm:$0xf0]  ;;  %v1236_v25 = vor.u32 %v1547_v21, %v1233_v22  ;;  %v1223_v27 = vld [vmem:[%s2561_s0] sm:$0xf] }
   0x7   :  { %v1609_v26 = vld [vmem:[%s2560_s1] sm:$0xff]  ;;  %v1546_v28 = vld [vmem:[%s2561_s0 + $0x4] sm:$0xf0]  ;;  %v1372_v31 = vor.u32 %v1581_v23, %v1369_v24  ;;  %v1241_v35 = vld [vmem:[%s2561_s0 + $0x28] sm:$0xf0] }
   0x8   :  { %725 = vmatpush.bf16.msra.mxu1 %v548_v8  ;;  %1626 = vmatpush.bf16.msra.mxu3 %v548_v8  ;;  %v1351_v29 = vld [vmem:[%s2561_s0 + $0x100] sm:$0xf]  ;;  %v1578_v30 = vld [vmem:[%s2561_s0 + $0x104] sm:$0xf0]  ;;  %v1224_v32 = vor.u32 %v1546_v28, %v1223_v27  ;;  %v1549_v34 = vld [vmem:[%s2561_s0 + $0x24] sm:$0xf] }
   0x9   :  { %v1352_v33 = vor.u32 %v1578_v30, %v1351_v29  ;;  %v1583_v36 = vld [vmem:[%s2561_s0 + $0x134] sm:$0xf]  ;;  %v1377_v37 = vld [vmem:[%s2561_s0 + $0x138] sm:$0xf0]  ;;  %v1244_v38 = vor.u32 %v1549_v34, %v1241_v35  ;;  %v1231_v39 = vld [vmem:[%s2561_s0 + $0x10] sm:$0xf] }
   0xa   :  { %552 = vmatpush.bf16.msra.mxu0 %v1614_v9  ;;  %1620 = vmatpush.bf16.msra.mxu2 %v1614_v9  ;;  %v1548_v40 = vld [vmem:[%s2561_s0 + $0x14] sm:$0xf0]  ;;  %v1359_v41 = vld [vmem:[%s2561_s0 + $0x110] sm:$0xf]  ;;  %v1380_v43 = vor.u32 %v1583_v36, %v1377_v37  ;;  %v1551_v46 = vld [vmem:[%s2561_s0 + $0x34] sm:$0xf] }
   0xb   :  { %v1580_v42 = vld [vmem:[%s2561_s0 + $0x114] sm:$0xf0]  ;;  %v1232_v44 = vor.u32 %v1548_v40, %v1231_v39  ;;  %v1249_v47 = vld [vmem:[%s2561_s0 + $0x38] sm:$0xf0]  ;;  %v1585_v48 = vld [vmem:[%s2561_s0 + $0x144] sm:$0xf] }
   0xc   :  { %726 = vmatpush.bf16.msra.mxu1 %v1617_v10  ;;  %1627 = vmatpush.bf16.msra.mxu3 %v1617_v10  ;;  %v1360_v45 = vor.u32 %v1580_v42, %v1359_v41  ;;  %v1385_v49 = vld [vmem:[%s2561_s0 + $0x148] sm:$0xf0]  ;;  %v1252_v50 = vor.u32 %v1551_v46, %v1249_v47  ;;  %v1239_v51 = vld [vmem:[%s2561_s0 + $0x20] sm:$0xf]  ;;  %v1550_v52 = vld [vmem:[%s2561_s0 + $0x24] sm:$0xf0] }
   0xd   :  { %v1367_v53 = vld [vmem:[%s2561_s0 + $0x120] sm:$0xf]  ;;  %v1582_v54 = vld [vmem:[%s2561_s0 + $0x124] sm:$0xf0]  ;;  %v1388_v55 = vor.u32 %v1585_v48, %v1385_v49  ;;  %v1240_v56 = vor.u32 %v1550_v52, %v1239_v51  ;;  %v1553_v58 = vld [vmem:[%s2561_s0 + $0x44] sm:$0xf] }
   0xe   :  { %553 = vmatpush.bf16.msra.mxu0 %v1613_v16  ;;  %1621 = vmatpush.bf16.msra.mxu2 %v1613_v16  ;;  %v1368_v57 = vor.u32 %v1582_v54, %v1367_v53  ;;  %v1257_v59 = vld [vmem:[%s2561_s0 + $0x48] sm:$0xf0]  ;;  %v1587_v60 = vld [vmem:[%s2561_s0 + $0x154] sm:$0xf]  ;;  %v1393_v61 = vld [vmem:[%s2561_s0 + $0x158] sm:$0xf0] }
   0xf   :  { %1513 = vmatmul.msk.bf16.vlgmr.msra.gmra.mxu1 %vm446_vm2, %v1228_v15  ;;  %1530 = vmatmul.msk.bf16.vlgmr.msra.gmra.mxu3 %vm446_vm2, %v1364_v17  ;;  %v1260_v62 = vor.u32 %v1553_v58, %v1257_v59  ;;  %v1247_v63 = vld [vmem:[%s2561_s0 + $0x30] sm:$0xf]  ;;  %v1552_v0 = vld [vmem:[%s2561_s0 + $0x34] sm:$0xf0]  ;;  %v1396_v3 = vor.u32 %v1587_v60, %v1393_v61  ;;  %v1555_v6 = vld [vmem:[%s2561_s0 + $0x54] sm:$0xf] }
  0x10   :  { %v1375_v1 = vld [vmem:[%s2561_s0 + $0x130] sm:$0xf]  ;;  %v1584_v2 = vld [vmem:[%s2561_s0 + $0x134] sm:$0xf0]  ;;  %v1248_v4 = vor.u32 %v1552_v0, %v1247_v63  ;;  %v1265_v7 = vld [vmem:[%s2561_s0 + $0x58] sm:$0xf0] }
  0x11   :  { %v1376_v5 = vor.u32 %v1584_v2, %v1375_v1  ;;  %v1589_v8 = vld [vmem:[%s2561_s0 + $0x164] sm:$0xf]  ;;  %v1401_v9 = vld [vmem:[%s2561_s0 + $0x168] sm:$0xf0]  ;;  %v1268_v10 = vor.u32 %v1555_v6, %v1265_v7  ;;  %v1255_v11 = vld [vmem:[%s2561_s0 + $0x40] sm:$0xf] }
  0x12   :  { %554 = vmatpush.bf16.msra.mxu0 %v1612_v18  ;;  %1622 = vmatpush.bf16.msra.mxu2 %v1612_v18  ;;  %v1554_v12 = vld [vmem:[%s2561_s0 + $0x44] sm:$0xf0]  ;;  %v1383_v13 = vld [vmem:[%s2561_s0 + $0x140] sm:$0xf]  ;;  %v1404_v15 = vor.u32 %v1589_v8, %v1401_v9  ;;  %v1557_v18 = vld [vmem:[%s2561_s0 + $0x64] sm:$0xf] }
  0x13   :  { %v1586_v14 = vld [vmem:[%s2561_s0 + $0x144] sm:$0xf0]  ;;  %v1256_v16 = vor.u32 %v1554_v12, %v1255_v11  ;;  %v1409_v21 = vld [vmem:[%s2561_s0 + $0x178] sm:$0xf0]  ;;  %v1263_v23 = vld [vmem:[%s2561_s0 + $0x50] sm:$0xf] }
  0x14   :  { %v1384_v17 = vor.u32 %v1586_v14, %v1383_v13  ;;  %v1556_v24 = vld [vmem:[%s2561_s0 + $0x54] sm:$0xf0]  ;;  %v1559_v30 = vld [vmem:[%s2561_s0 + $0x74] sm:$0xf]  ;;  %v1271_v35 = vld [vmem:[%s2561_s0 + $0x60] sm:$0xf] }
  0x15   :  { %v1264_v28 = vor.u32 %v1556_v24, %v1263_v23  ;;  %v1558_v36 = vld [vmem:[%s2561_s0 + $0x64] sm:$0xf0]  ;;  %v1399_v37 = vld [vmem:[%s2561_s0 + $0x160] sm:$0xf]  ;;  %v1561_v42 = vld [vmem:[%s2561_s0 + $0x84] sm:$0xf] }
  0x16   :  { %555 = vmatpush.bf16.msra.mxu0 %v1611_v19  ;;  %1623 = vmatpush.bf16.msra.mxu2 %v1611_v19  ;;  %v1273_v19 = vld [vmem:[%s2561_s0 + $0x68] sm:$0xf0]  ;;  %v1272_v40 = vor.u32 %v1558_v36, %v1271_v35  ;;  %v1279_v47 = vld [vmem:[%s2561_s0 + $0x70] sm:$0xf]  ;;  %v1560_v48 = vld [vmem:[%s2561_s0 + $0x74] sm:$0xf0] }
  0x17   :  { %v1276_v22 = vor.u32 %v1557_v18, %v1273_v19  ;;  %v1592_v51 = vld [vmem:[%s2561_s0 + $0x174] sm:$0xf0]  ;;  %v1280_v53 = vor.u32 %v1560_v48, %v1279_v47  ;;  %v1297_v58 = vld [vmem:[%s2561_s0 + $0x98] sm:$0xf0]  ;;  %v1597_v59 = vld [vmem:[%s2561_s0 + $0x1a4] sm:$0xf] }
  0x18   :  { %v1433_v60 = vld [vmem:[%s2561_s0 + $0x1a8] sm:$0xf0]  ;;  %v1562_v63 = vld [vmem:[%s2561_s0 + $0x84] sm:$0xf0]  ;;  %v1415_v2 = vld [vmem:[%s2561_s0 + $0x180] sm:$0xf] }
  0x19   :  { %v1441_v23 = vld [vmem:[%s2561_s0 + $0x1b8] sm:$0xf0] }
  0x1a   :  { %556 = vmatpush.bf16.msra.mxu0 %v1610_v20  ;;  %1624 = vmatpush.bf16.msra.mxu2 %v1610_v20  ;;  %v1591_v20 = vld [vmem:[%s2561_s0 + $0x174] sm:$0xf] }
  0x1b   :  { %v1412_v27 = vor.u32 %v1591_v20, %v1409_v21  ;;  %v1565_v20 = vld [vmem:[%s2561_s0 + $0xa4] sm:$0xf]  ;;  %v1305_v21 = vld [vmem:[%s2561_s0 + $0xa8] sm:$0xf0] }
  0x1e   :  { %557 = vmatpush.bf16.msra.mxu0 %v1609_v26  ;;  %1625 = vmatpush.bf16.msra.mxu2 %v1609_v26  ;;  %v1588_v26 = vld [vmem:[%s2561_s0 + $0x154] sm:$0xf0] }
  0x1f   :  { %1514 = vmatmul.msk.bf16.gmra.mxu1 %vm446_vm2, %v1236_v25  ;;  %1531 = vmatmul.msk.bf16.gmra.mxu3 %vm446_vm2, %v1372_v31  ;;  %v1391_v25 = vld [vmem:[%s2561_s0 + $0x150] sm:$0xf]  ;;  %v1281_v31 = vld [vmem:[%s2561_s0 + $0x78] sm:$0xf0] }
  0x20   :  { %v1392_v29 = vor.u32 %v1588_v26, %v1391_v25  ;;  %v1284_v34 = vor.u32 %v1559_v30, %v1281_v31  ;;  %v1308_v25 = vor.u32 %v1565_v20, %v1305_v21  ;;  %v1295_v26 = vld [vmem:[%s2561_s0 + $0x90] sm:$0xf] }
  0x21   :  { %558 = vmatmul.bf16.vlgmr.msra.gmra.mxu0 %v1224_v32  ;;  %638 = vmatmul.bf16.vlgmr.msra.gmra.mxu2 %v1352_v33  ;;  %v1593_v32 = vld [vmem:[%s2561_s0 + $0x184] sm:$0xf]  ;;  %v1417_v33 = vld [vmem:[%s2561_s0 + $0x188] sm:$0xf0]  ;;  %v1423_v31 = vld [vmem:[%s2561_s0 + $0x190] sm:$0xf] }
  0x22   :  { %v1420_v39 = vor.u32 %v1593_v32, %v1417_v33  ;;  %v1596_v32 = vld [vmem:[%s2561_s0 + $0x194] sm:$0xf0] }
  0x2f   :  { %1515 = vmatmul.msk.bf16.gmra.mxu1 %vm446_vm2, %v1244_v38  ;;  %1532 = vmatmul.msk.bf16.gmra.mxu3 %vm446_vm2, %v1380_v43  ;;  %v1590_v38 = vld [vmem:[%s2561_s0 + $0x164] sm:$0xf0]  ;;  %v1289_v43 = vld [vmem:[%s2561_s0 + $0x88] sm:$0xf0] }
  0x30   :  { %v1400_v41 = vor.u32 %v1590_v38, %v1399_v37  ;;  %v1292_v46 = vor.u32 %v1561_v42, %v1289_v43  ;;  %v1424_v38 = vor.u32 %v1596_v32, %v1423_v31  ;;  %v1569_v32 = vld [vmem:[%s2561_s0 + $0xc4] sm:$0xf] }
  0x31   :  { %563 = vmatmul.bf16.gmra.mxu0 %v1232_v44  ;;  %643 = vmatmul.bf16.gmra.mxu2 %v1360_v45  ;;  %v1595_v44 = vld [vmem:[%s2561_s0 + $0x194] sm:$0xf]  ;;  %v1425_v45 = vld [vmem:[%s2561_s0 + $0x198] sm:$0xf0] }
  0x32   :  { %v1428_v52 = vor.u32 %v1595_v44, %v1425_v45 }
  0x3f   :  { %1516 = vmatmul.msk.bf16.gmra.mxu1 %vm446_vm2, %v1252_v50  ;;  %1533 = vmatmul.msk.bf16.gmra.mxu3 %vm446_vm2, %v1388_v55  ;;  %v1407_v50 = vld [vmem:[%s2561_s0 + $0x170] sm:$0xf] }
  0x40   :  { %v1408_v54 = vor.u32 %v1592_v51, %v1407_v50  ;;  %v1567_v51 = vld [vmem:[%s2561_s0 + $0xb4] sm:$0xf] }
  0x41   :  { %568 = vmatmul.bf16.gmra.mxu0 %v1240_v56  ;;  %648 = vmatmul.bf16.gmra.mxu2 %v1368_v57  ;;  %v1563_v57 = vld [vmem:[%s2561_s0 + $0x94] sm:$0xf] }
  0x42   :  { %v1300_v61 = vor.u32 %v1563_v57, %v1297_v58 }
  0x4f   :  { %1517 = vmatmul.msk.bf16.gmra.mxu1 %vm446_vm2, %v1260_v62  ;;  %1534 = vmatmul.msk.bf16.gmra.mxu3 %vm446_vm2, %v1396_v3  ;;  %v1287_v62 = vld [vmem:[%s2561_s0 + $0x80] sm:$0xf]  ;;  %v1594_v3 = vld [vmem:[%s2561_s0 + $0x184] sm:$0xf0] }
  0x50   :  { %v1288_v6 = vor.u32 %v1562_v63, %v1287_v62  ;;  %v1416_v8 = vor.u32 %v1594_v3, %v1415_v2  ;;  %v1598_v2 = vld [vmem:[%s2561_s0 + $0x1a4] sm:$0xf0] }
  0x51   :  { %573 = vmatmul.bf16.gmra.mxu0 %v1248_v4  ;;  %653 = vmatmul.bf16.gmra.mxu2 %v1376_v5  ;;  %v1436_v4 = vor.u32 %v1597_v59, %v1433_v60  ;;  %v1942_v5 = vld [vmem:[%s2562_s2] ss:$0 sm:$0xff]  ;;  %v1566_v60 = vld [vmem:[%s2561_s0 + $0xa4] sm:$0xf0] }
  0x52   :  { %v1303_v59 = vld [vmem:[%s2561_s0 + $0xa0] sm:$0xf] }
  0x5f   :  { %1518 = vmatmul.msk.bf16.gmra.mxu1 %vm446_vm2, %v1268_v10  ;;  %1535 = vmatmul.msk.bf16.gmra.mxu3 %vm446_vm2, %v1404_v15  ;;  %v1948_v10 = vld [vmem:[%s2563_s3] ss:$0 sm:$0xff] }
  0x61   :  { %578 = vmatmul.bf16.gmra.mxu0 %v1256_v16  ;;  %658 = vmatmul.bf16.gmra.mxu2 %v1384_v17 }
  0x6f   :  { %1519 = vmatmul.msk.bf16.gmra.mxu1 %vm446_vm2, %v1276_v22  ;;  %1536 = vmatmul.msk.bf16.gmra.mxu3 %vm446_vm2, %v1412_v27  ;;  %v1599_v22 = vld [vmem:[%s2561_s0 + $0x1b4] sm:$0xf]  ;;  %v1564_v27 = vld [vmem:[%s2561_s0 + $0x94] sm:$0xf0] }
  0x70   :  { %v1444_v33 = vor.u32 %v1599_v22, %v1441_v23  ;;  %v1296_v36 = vor.u32 %v1564_v27, %v1295_v26 }
  0x71   :  { %583 = vmatmul.bf16.gmra.mxu0 %v1264_v28  ;;  %663 = vmatmul.bf16.gmra.mxu2 %v1392_v29 }
  0x7f   :  { %1520 = vmatmul.msk.bf16.gmra.mxu1 %vm446_vm2, %v1284_v34  ;;  %1537 = vmatmul.msk.bf16.gmra.mxu3 %vm446_vm2, %v1420_v39 }
  0x81   :  { %588 = vmatmul.bf16.gmra.mxu0 %v1272_v40  ;;  %668 = vmatmul.bf16.gmra.mxu2 %v1400_v41 }
  0x8c   :  { %v728_v49 = vpop.f32.mrf.mxu1 }
  0x8f   :  { %1521 = vmatmul.msk.bf16.gmra.mxu1 %vm446_vm2, %v1292_v46  ;;  %1538 = vmatmul.msk.bf16.gmra.mxu3 %vm446_vm2, %v1428_v52  ;;  %v1313_v52 = vld [vmem:[%s2561_s0 + $0xb8] sm:$0xf0] }
  0x90   :  { %v1316_v58 = vor.u32 %v1567_v51, %v1313_v52 }
  0x91   :  { %593 = vmatmul.bf16.gmra.mxu0 %v1280_v53  ;;  %673 = vmatmul.bf16.gmra.mxu2 %v1408_v54  ;;  %v1601_v54 = vld [vmem:[%s2561_s0 + $0x1c4] sm:$0xf] }
  0x92   :  { %v1911_v55 = vpop.f32.mrf.mxu3 }
  0x94   :  { %v730_v56 = vpop.f32.mrf.mxu1 }
  0x9a   :  { %v1931_v0 = vpop.f32.mrf.mxu3 }
  0x9c   :  { %v733_v1 = vpop.f32.mrf.mxu1 }
  0x9e   :  { %v559_v7 = vpop.f32.mrf.mxu0 }
  0x9f   :  { %1522 = vmatmul.msk.bf16.gmra.mxu1 %vm446_vm2, %v1300_v61  ;;  %v729_v9 = vadd.f32 %v728_v49, %v559_v7  ;;  %1539 = vmatmul.msk.bf16.gmra.mxu3 %vm446_vm2, %v1436_v4 }
  0xa1   :  { %v892_v11 = vmul.f32 %v1942_v5, %v729_v9  ;;  %598 = vmatmul.bf16.gmra.mxu0 %v1288_v6  ;;  %678 = vmatmul.bf16.gmra.mxu2 %v1416_v8  ;;  %v1304_v8 = vor.u32 %v1566_v60, %v1303_v59 }
  0xa2   :  { %v1952_v12 = vpop.f32.mrf.mxu3 }
  0xa3   :  { %v960_v13 = vadd.f32 %v1948_v10, %v892_v11 }
  0xa4   :  { %v735_v14 = vpop.f32.mrf.mxu1  ;;  %v1955_v16 = vpop.f32.mrf.mxu2 }
  0xa5   :  { %v1024_v15 = vmax.f32 %v960_v13, 0.0 }
  0xa6   :  { %v561_v17 = vpop.f32.mrf.mxu0 }
  0xa7   :  { %v1088_v18 = vpack.c.bf16 %v1024_v15, %v1024_v15  ;;  %v731_v19 = vadd.f32 %v730_v56, %v561_v17 }
  0xa9   :  { %1153 = vst.msk [vmem:[%s2564_s4] sm:$0xf] %vm1152_vm3, %v1088_v18  ;;  %v893_v24 = vmul.f32 %v1942_v5, %v731_v19 }
  0xaa   :  { %v1980_v28 = vpop.f32.mrf.mxu3 }
  0xab   :  { %v961_v29 = vadd.f32 %v1948_v10, %v893_v24 }
  0xac   :  { %v738_v30 = vpop.f32.mrf.mxu1  ;;  %v1989_v35 = vpop.f32.mrf.mxu2 }
  0xad   :  { %v1025_v34 = vmax.f32 %v961_v29, 0.0 }
  0xae   :  { %v564_v37 = vpop.f32.mrf.mxu0 }
  0xaf   :  { %1523 = vmatmul.msk.bf16.gmra.mxu1 %vm446_vm2, %v1308_v25  ;;  %v1089_v39 = vpack.c.bf16 %v1025_v34, %v1025_v34  ;;  %v734_v40 = vadd.f32 %v733_v1, %v564_v37  ;;  %1540 = vmatmul.msk.bf16.gmra.mxu3 %vm446_vm2, %v1444_v33  ;;  %v1431_v1 = vld [vmem:[%s2561_s0 + $0x1a0] sm:$0xf]  ;;  %v1321_v33 = vld [vmem:[%s2561_s0 + $0xc8] sm:$0xf0] }
  0xb1   :  { %1154 = vst.msk [vmem:[%s2564_s4 + $0x4] sm:$0xf] %vm1152_vm3, %v1089_v39  ;;  %v894_v41 = vmul.f32 %v1942_v5, %v734_v40  ;;  %603 = vmatmul.bf16.gmra.mxu0 %v1296_v36  ;;  %683 = vmatmul.bf16.gmra.mxu2 %v1424_v38  ;;  %v1457_v36 = vld [vmem:[%s2561_s0 + $0x1d8] sm:$0xf0]  ;;  %v1324_v39 = vor.u32 %v1569_v32, %v1321_v33  ;;  %v1311_v40 = vld [vmem:[%s2561_s0 + $0xb0] sm:$0xf] }
  0xb2   :  { %v1998_v42 = vpop.f32.mrf.mxu3 }
  0xb3   :  { %v962_v43 = vadd.f32 %v1948_v10, %v894_v41  ;;  %v1568_v41 = vld [vmem:[%s2561_s0 + $0xb4] sm:$0xf0] }
  0xb4   :  { %v740_v44 = vpop.f32.mrf.mxu1  ;;  %v644_v46 = vpop.f32.mrf.mxu2  ;;  %v1312_v52 = vor.u32 %v1568_v41, %v1311_v40 }
  0xb5   :  { %v1026_v45 = vmax.f32 %v962_v43, 0.0  ;;  %v814_v47 = vadd.f32 %v1911_v55, %v644_v46  ;;  %v1449_v55 = vld [vmem:[%s2561_s0 + $0x1c8] sm:$0xf0]  ;;  %v1439_v46 = vld [vmem:[%s2561_s0 + $0x1b0] sm:$0xf] }
  0xb6   :  { %v566_v48 = vpop.f32.mrf.mxu0  ;;  %v1452_v3 = vor.u32 %v1601_v54, %v1449_v55 }
  0xb7   :  { %v1090_v49 = vpack.c.bf16 %v1026_v45, %v1026_v45  ;;  %v736_v50 = vadd.f32 %v735_v14, %v566_v48  ;;  %v926_v53 = vmul.f32 %v1942_v5, %v814_v47  ;;  %v1432_v14 = vor.u32 %v1598_v2, %v1431_v1  ;;  %v1600_v47 = vld [vmem:[%s2561_s0 + $0x1b4] sm:$0xf0] }
  0xb9   :  { %1155 = vst.msk [vmem:[%s2564_s4 + $0x8] sm:$0xf] %vm1152_vm3, %v1090_v49  ;;  %v895_v56 = vmul.f32 %v1942_v5, %v736_v50  ;;  %v994_v57 = vadd.f32 %v1948_v10, %v926_v53 }
  0xba   :  { %v2027_v61 = vpop.f32.mrf.mxu3 }
  0xbb   :  { %v963_v62 = vadd.f32 %v1948_v10, %v895_v56  ;;  %v1058_v4 = vmax.f32 %v994_v57, 0.0  ;;  %v1440_v56 = vor.u32 %v1600_v47, %v1439_v46 }
  0xbc   :  { %v743_v63 = vpop.f32.mrf.mxu1  ;;  %v646_v7 = vpop.f32.mrf.mxu2 }
  0xbd   :  { %v1027_v6 = vmax.f32 %v963_v62, 0.0  ;;  %v1122_v9 = vpack.c.bf16 %v1058_v4, %v1058_v4  ;;  %v816_v11 = vadd.f32 %v1931_v0, %v646_v7 }
  0xbe   :  { %v569_v13 = vpop.f32.mrf.mxu0 }
  0xbf   :  { %1524 = vmatmul.msk.bf16.gmra.mxu1 %vm446_vm2, %v1316_v58  ;;  %v1091_v15 = vpack.c.bf16 %v1027_v6, %v1027_v6  ;;  %v739_v17 = vadd.f32 %v738_v30, %v569_v13  ;;  %1541 = vmatmul.msk.bf16.gmra.mxu3 %vm446_vm2, %v1452_v3  ;;  %1187 = vst.msk [vmem:[%s2564_s4 + $0x88] sm:$0xf] %vm1152_vm3, %v1122_v9  ;;  %v1571_v13 = vld [vmem:[%s2561_s0 + $0xd4] sm:$0xf] }
  0xc0   :  { %v927_v18 = vmul.f32 %v1942_v5, %v816_v11 }
  0xc1   :  { %1156 = vst.msk [vmem:[%s2564_s4 + $0xc] sm:$0xf] %vm1152_vm3, %v1091_v15  ;;  %v896_v0 = vmul.f32 %v1942_v5, %v739_v17  ;;  %608 = vmatmul.bf16.gmra.mxu0 %v1304_v8  ;;  %688 = vmatmul.bf16.gmra.mxu2 %v1432_v14  ;;  %v1329_v14 = vld [vmem:[%s2561_s0 + $0xd8] sm:$0xf0]  ;;  %v1465_v17 = vld [vmem:[%s2561_s0 + $0x1e8] sm:$0xf0] }
  0xc2   :  { %v995_v19 = vadd.f32 %v1948_v10, %v927_v18  ;;  %v2050_v20 = vpop.f32.mrf.mxu3 }
  0xc3   :  { %v964_v21 = vadd.f32 %v1948_v10, %v896_v0 }
  0xc4   :  { %v745_v22 = vpop.f32.mrf.mxu1  ;;  %v1059_v23 = vmax.f32 %v995_v19, 0.0  ;;  %v649_v25 = vpop.f32.mrf.mxu2  ;;  %v1332_v19 = vor.u32 %v1571_v13, %v1329_v14 }
  0xc5   :  { %v1028_v24 = vmax.f32 %v964_v21, 0.0  ;;  %v819_v27 = vadd.f32 %v1952_v12, %v649_v25  ;;  %v1603_v12 = vld [vmem:[%s2561_s0 + $0x1d4] sm:$0xf]  ;;  %v1319_v21 = vld [vmem:[%s2561_s0 + $0xc0] sm:$0xf] }
  0xc6   :  { %v1123_v26 = vpack.c.bf16 %v1059_v23, %v1059_v23  ;;  %v571_v29 = vpop.f32.mrf.mxu0  ;;  %v1460_v48 = vor.u32 %v1603_v12, %v1457_v36 }
  0xc7   :  { %v1092_v30 = vpack.c.bf16 %v1028_v24, %v1028_v24  ;;  %v741_v31 = vadd.f32 %v740_v44, %v571_v29  ;;  %v928_v34 = vmul.f32 %v1942_v5, %v819_v27  ;;  %v1602_v27 = vld [vmem:[%s2561_s0 + $0x1c4] sm:$0xf0] }
  0xc8   :  { %1188 = vst.msk [vmem:[%s2564_s4 + $0x8c] sm:$0xf] %vm1152_vm3, %v1123_v26  ;;  %v1447_v26 = vld [vmem:[%s2561_s0 + $0x1c0] sm:$0xf] }
  0xc9   :  { %1157 = vst.msk [vmem:[%s2564_s4 + $0x10] sm:$0xf] %vm1152_vm3, %v1092_v30  ;;  %v897_v37 = vmul.f32 %v1942_v5, %v741_v31  ;;  %v996_v38 = vadd.f32 %v1948_v10, %v928_v34 }
  0xca   :  { %v2083_v43 = vpop.f32.mrf.mxu3 }
  0xcb   :  { %v965_v44 = vadd.f32 %v1948_v10, %v897_v37  ;;  %v1060_v49 = vmax.f32 %v996_v38, 0.0  ;;  %v1448_v37 = vor.u32 %v1602_v27, %v1447_v26 }
  0xcc   :  { %v748_v45 = vpop.f32.mrf.mxu1  ;;  %v651_v51 = vpop.f32.mrf.mxu2 }
  0xcd   :  { %v1029_v50 = vmax.f32 %v965_v44, 0.0  ;;  %v1124_v53 = vpack.c.bf16 %v1060_v49, %v1060_v49  ;;  %v821_v54 = vadd.f32 %v1980_v28, %v651_v51 }
  0xce   :  { %v574_v55 = vpop.f32.mrf.mxu0 }
  0xcf   :  { %1525 = vmatmul.msk.bf16.gmra.mxu1 %vm446_vm2, %v1324_v39  ;;  %v1093_v57 = vpack.c.bf16 %v1029_v50, %v1029_v50  ;;  %v744_v58 = vadd.f32 %v743_v63, %v574_v55  ;;  %1542 = vmatmul.msk.bf16.gmra.mxu3 %vm446_vm2, %v1460_v48  ;;  %1189 = vst.msk [vmem:[%s2564_s4 + $0x90] sm:$0xf] %vm1152_vm3, %v1124_v53  ;;  %v1573_v55 = vld [vmem:[%s2561_s0 + $0xe4] sm:$0xf] }
  0xd0   :  { %v929_v59 = vmul.f32 %v1942_v5, %v821_v54 }
  0xd1   :  { %1158 = vst.msk [vmem:[%s2564_s4 + $0x14] sm:$0xf] %vm1152_vm3, %v1093_v57  ;;  %v898_v28 = vmul.f32 %v1942_v5, %v744_v58  ;;  %613 = vmatmul.bf16.gmra.mxu0 %v1312_v52  ;;  %693 = vmatmul.bf16.gmra.mxu2 %v1440_v56  ;;  %v1337_v56 = vld [vmem:[%s2561_s0 + $0xe8] sm:$0xf0]  ;;  %v1473_v58 = vld [vmem:[%s2561_s0 + $0x1f8] sm:$0xf0] }
  0xd2   :  { %v997_v60 = vadd.f32 %v1948_v10, %v929_v59  ;;  %v2106_v62 = vpop.f32.mrf.mxu3 }
  0xd3   :  { %v966_v63 = vadd.f32 %v1948_v10, %v898_v28 }
  0xd4   :  { %v750_v1 = vpop.f32.mrf.mxu1  ;;  %v1061_v2 = vmax.f32 %v997_v60, 0.0  ;;  %v654_v4 = vpop.f32.mrf.mxu2  ;;  %v1340_v60 = vor.u32 %v1573_v55, %v1337_v56 }
  0xd5   :  { %v1030_v3 = vmax.f32 %v966_v63, 0.0  ;;  %v824_v7 = vadd.f32 %v1998_v42, %v654_v4  ;;  %v1605_v42 = vld [vmem:[%s2561_s0 + $0x1e4] sm:$0xf]  ;;  %v1327_v63 = vld [vmem:[%s2561_s0 + $0xd0] sm:$0xf] }
  0xd6   :  { %v1125_v6 = vpack.c.bf16 %v1061_v2, %v1061_v2  ;;  %v576_v8 = vpop.f32.mrf.mxu0  ;;  %v1468_v29 = vor.u32 %v1605_v42, %v1465_v17 }
  0xd7   :  { %v1094_v9 = vpack.c.bf16 %v1030_v3, %v1030_v3  ;;  %v746_v11 = vadd.f32 %v745_v22, %v576_v8  ;;  %v930_v15 = vmul.f32 %v1942_v5, %v824_v7  ;;  %v1570_v22 = vld [vmem:[%s2561_s0 + $0xc4] sm:$0xf0]  ;;  %v1604_v7 = vld [vmem:[%s2561_s0 + $0x1d4] sm:$0xf0] }
  0xd8   :  { %1190 = vst.msk [vmem:[%s2564_s4 + $0x94] sm:$0xf] %vm1152_vm3, %v1125_v6  ;;  %v1320_v33 = vor.u32 %v1570_v22, %v1319_v21  ;;  %v1455_v6 = vld [vmem:[%s2561_s0 + $0x1d0] sm:$0xf] }
  0xd9   :  { %1159 = vst.msk [vmem:[%s2564_s4 + $0x18] sm:$0xf] %vm1152_vm3, %v1094_v9  ;;  %v899_v18 = vmul.f32 %v1942_v5, %v746_v11  ;;  %v998_v0 = vadd.f32 %v1948_v10, %v930_v15 }
  0xda   :  { %v2139_v23 = vpop.f32.mrf.mxu3 }
  0xdb   :  { %v967_v24 = vadd.f32 %v1948_v10, %v899_v18  ;;  %v1062_v30 = vmax.f32 %v998_v0, 0.0  ;;  %v1456_v18 = vor.u32 %v1604_v7, %v1455_v6 }
  0xdc   :  { %v753_v25 = vpop.f32.mrf.mxu1  ;;  %v656_v32 = vpop.f32.mrf.mxu2 }
  0xdd   :  { %v1031_v31 = vmax.f32 %v967_v24, 0.0  ;;  %v1126_v34 = vpack.c.bf16 %v1062_v30, %v1062_v30  ;;  %v826_v12 = vadd.f32 %v2027_v61, %v656_v32 }
  0xde   :  { %v579_v36 = vpop.f32.mrf.mxu0 }
  0xdf   :  { %1526 = vmatmul.msk.bf16.gmra.mxu1 %vm446_vm2, %v1332_v19  ;;  %v1095_v38 = vpack.c.bf16 %v1031_v31, %v1031_v31  ;;  %v749_v39 = vadd.f32 %v748_v45, %v579_v36  ;;  %1543 = vmatmul.msk.bf16.gmra.mxu3 %vm446_vm2, %v1468_v29  ;;  %1191 = vst.msk [vmem:[%s2564_s4 + $0x98] sm:$0xf] %vm1152_vm3, %v1126_v34  ;;  %v1575_v36 = vld [vmem:[%s2561_s0 + $0xf4] sm:$0xf] }
  0xe0   :  { %v931_v40 = vmul.f32 %v1942_v5, %v826_v12 }
  0xe1   :  { %1160 = vst.msk [vmem:[%s2564_s4 + $0x1c] sm:$0xf] %vm1152_vm3, %v1095_v38  ;;  %v900_v61 = vmul.f32 %v1942_v5, %v749_v39  ;;  %618 = vmatmul.bf16.gmra.mxu0 %v1320_v33  ;;  %698 = vmatmul.bf16.gmra.mxu2 %v1448_v37  ;;  %v1345_v37 = vld [vmem:[%s2561_s0 + $0xf8] sm:$0xf0] }
  0xe2   :  { %v999_v41 = vadd.f32 %v1948_v10, %v931_v40  ;;  %v2162_v44 = vpop.f32.mrf.mxu3  ;;  %v1348_v40 = vor.u32 %v1575_v36, %v1345_v37 }
  0xe3   :  { %v968_v45 = vadd.f32 %v1948_v10, %v900_v61  ;;  %v1335_v61 = vld [vmem:[%s2561_s0 + $0xe0] sm:$0xf] }
  0xe4   :  { %v755_v46 = vpop.f32.mrf.mxu1  ;;  %v1063_v47 = vmax.f32 %v999_v41, 0.0  ;;  %v659_v49 = vpop.f32.mrf.mxu2  ;;  %v1574_v41 = vld [vmem:[%s2561_s0 + $0xe4] sm:$0xf0] }
  0xe5   :  { %v1032_v48 = vmax.f32 %v968_v45, 0.0  ;;  %v829_v51 = vadd.f32 %v2050_v20, %v659_v49  ;;  %v1607_v20 = vld [vmem:[%s2561_s0 + $0x1f4] sm:$0xf] }
  0xe6   :  { %v1127_v50 = vpack.c.bf16 %v1063_v47, %v1063_v47  ;;  %v581_v52 = vpop.f32.mrf.mxu0  ;;  %v1476_v8 = vor.u32 %v1607_v20, %v1473_v58  ;;  %v1463_v47 = vld [vmem:[%s2561_s0 + $0x1e0] sm:$0xf] }
  0xe7   :  { %v1096_v53 = vpack.c.bf16 %v1032_v48, %v1032_v48  ;;  %v751_v54 = vadd.f32 %v750_v1, %v581_v52  ;;  %v932_v57 = vmul.f32 %v1942_v5, %v829_v51  ;;  %v1572_v1 = vld [vmem:[%s2561_s0 + $0xd4] sm:$0xf0]  ;;  %v1606_v48 = vld [vmem:[%s2561_s0 + $0x1e4] sm:$0xf0]  ;;  %v1336_v52 = vor.u32 %v1574_v41, %v1335_v61 }
  0xe8   :  { %1192 = vst.msk [vmem:[%s2564_s4 + $0x9c] sm:$0xf] %vm1152_vm3, %v1127_v50  ;;  %v1328_v14 = vor.u32 %v1572_v1, %v1327_v63 }
  0xe9   :  { %1161 = vst.msk [vmem:[%s2564_s4 + $0x20] sm:$0xf] %vm1152_vm3, %v1096_v53  ;;  %v901_v59 = vmul.f32 %v1942_v5, %v751_v54  ;;  %v1000_v28 = vadd.f32 %v1948_v10, %v932_v57  ;;  %v1464_v57 = vor.u32 %v1606_v48, %v1463_v47 }
  0xea   :  { %v2195_v2 = vpop.f32.mrf.mxu3 }
  0xeb   :  { %v969_v3 = vadd.f32 %v1948_v10, %v901_v59  ;;  %v1064_v9 = vmax.f32 %v1000_v28, 0.0 }
  0xec   :  { %v758_v4 = vpop.f32.mrf.mxu1  ;;  %v661_v13 = vpop.f32.mrf.mxu2 }
  0xed   :  { %v1033_v11 = vmax.f32 %v969_v3, 0.0  ;;  %v1128_v15 = vpack.c.bf16 %v1064_v9, %v1064_v9  ;;  %v831_v42 = vadd.f32 %v2083_v43, %v661_v13  ;;  %v1577_v13 = vld [vmem:[%s2561_s0 + $0x104] sm:$0xf] }
  0xee   :  { %v584_v17 = vpop.f32.mrf.mxu0 }
  0xef   :  { %1527 = vmatmul.msk.bf16.gmra.mxu1 %vm446_vm2, %v1340_v60  ;;  %v1097_v0 = vpack.c.bf16 %v1033_v11, %v1033_v11  ;;  %v754_v19 = vadd.f32 %v753_v25, %v584_v17  ;;  %1544 = vmatmul.msk.bf16.gmra.mxu3 %vm446_vm2, %v1476_v8  ;;  %1193 = vst.msk [vmem:[%s2564_s4 + $0xa0] sm:$0xf] %vm1152_vm3, %v1128_v15 }
  0xf0   :  { %v933_v21 = vmul.f32 %v1942_v5, %v831_v42 }
  0xf1   :  { %1162 = vst.msk [vmem:[%s2564_s4 + $0x24] sm:$0xf] %vm1152_vm3, %v1097_v0  ;;  %v902_v43 = vmul.f32 %v1942_v5, %v754_v19  ;;  %623 = vmatmul.bf16.gmra.mxu0 %v1328_v14  ;;  %703 = vmatmul.bf16.gmra.mxu2 %v1456_v18  ;;  %v1353_v14 = vld [vmem:[%s2561_s0 + $0x108] sm:$0xf0]  ;;  %v1343_v0 = vld [vmem:[%s2561_s0 + $0xf0] sm:$0xf] }
  0xf2   :  { %v1001_v22 = vadd.f32 %v1948_v10, %v933_v21  ;;  %v2219_v26 = vpop.f32.mrf.mxu3  ;;  %v1356_v18 = vor.u32 %v1577_v13, %v1353_v14  ;;  %v1576_v19 = vld [vmem:[%s2561_s0 + $0xf4] sm:$0xf0] }
  0xf3   :  { %v970_v24 = vadd.f32 %v1948_v10, %v902_v43 }
  0xf4   :  { %v760_v25 = vpop.f32.mrf.mxu1  ;;  %v1065_v27 = vmax.f32 %v1001_v22, 0.0  ;;  %v664_v30 = vpop.f32.mrf.mxu2  ;;  %v1471_v22 = vld [vmem:[%s2561_s0 + $0x1f0] sm:$0xf] }
  0xf5   :  { %v1034_v29 = vmax.f32 %v970_v24, 0.0  ;;  %v834_v32 = vadd.f32 %v2106_v62, %v664_v30  ;;  %v1608_v24 = vld [vmem:[%s2561_s0 + $0x1f4] sm:$0xf0]  ;;  %v1344_v30 = vor.u32 %v1576_v19, %v1343_v0 }
  0xf6   :  { %v1129_v31 = vpack.c.bf16 %v1065_v27, %v1065_v27  ;;  %v586_v33 = vpop.f32.mrf.mxu0 }
  0xf7   :  { %v1098_v34 = vpack.c.bf16 %v1034_v29, %v1034_v29  ;;  %v756_v12 = vadd.f32 %v755_v46, %v586_v33  ;;  %v934_v38 = vmul.f32 %v1942_v5, %v834_v32 }
  0xf8   :  { %1194 = vst.msk [vmem:[%s2564_s4 + $0xa4] sm:$0xf] %vm1152_vm3, %v1129_v31 }
  0xf9   :  { %1163 = vst.msk [vmem:[%s2564_s4 + $0x28] sm:$0xf] %vm1152_vm3, %v1098_v34  ;;  %v903_v62 = vmul.f32 %v1942_v5, %v756_v12  ;;  %v1002_v39 = vadd.f32 %v1948_v10, %v934_v38  ;;  %v1472_v34 = vor.u32 %v1608_v24, %v1471_v22 }
  0xfa   :  { %v2252_v53 = vpop.f32.mrf.mxu3 }
  0xfb   :  { %v971_v45 = vadd.f32 %v1948_v10, %v903_v62  ;;  %v1066_v49 = vmax.f32 %v1002_v39, 0.0 }
  0xfc   :  { %v763_v46 = vpop.f32.mrf.mxu1  ;;  %v666_v51 = vpop.f32.mrf.mxu2 }
  0xfd   :  { %v1035_v50 = vmax.f32 %v971_v45, 0.0  ;;  %v1130_v54 = vpack.c.bf16 %v1066_v49, %v1066_v49  ;;  %v836_v55 = vadd.f32 %v2139_v23, %v666_v51 }
  0xfe   :  { %v589_v56 = vpop.f32.mrf.mxu0 }
  0xff   :  { %1528 = vmatmul.msk.bf16.gmra.mxu1 %vm446_vm2, %v1348_v40  ;;  %v1099_v20 = vpack.c.bf16 %v1035_v50, %v1035_v50  ;;  %v759_v58 = vadd.f32 %v758_v4, %v589_v56  ;;  %1195 = vst.msk [vmem:[%s2564_s4 + $0xa8] sm:$0xf] %vm1152_vm3, %v1130_v54  ;;  %v935_v59 = vmul.f32 %v1942_v5, %v836_v55 }
 0x101   :  { %1164 = vst.msk [vmem:[%s2564_s4 + $0x2c] sm:$0xf] %vm1152_vm3, %v1099_v20  ;;  %v904_v23 = vmul.f32 %v1942_v5, %v759_v58  ;;  %628 = vmatmul.bf16.gmra.mxu0 %v1336_v52  ;;  %v1003_v28 = vadd.f32 %v1948_v10, %v935_v59  ;;  %708 = vmatmul.bf16.gmra.mxu2 %v1464_v57 }
 0x102   :  { %v2275_v15 = vpop.f32.mrf.mxu3 }
 0x103   :  { %v972_v60 = vadd.f32 %v1948_v10, %v904_v23  ;;  %v1067_v1 = vmax.f32 %v1003_v28, 0.0 }
 0x104   :  { %v765_v63 = vpop.f32.mrf.mxu1  ;;  %v669_v4 = vpop.f32.mrf.mxu2 }
 0x105   :  { %v1036_v3 = vmax.f32 %v972_v60, 0.0  ;;  %v1131_v6 = vpack.c.bf16 %v1067_v1, %v1067_v1  ;;  %v839_v7 = vadd.f32 %v2162_v44, %v669_v4 }
 0x106   :  { %v591_v8 = vpop.f32.mrf.mxu0 }
 0x107   :  { %v1100_v9 = vpack.c.bf16 %v1036_v3, %v1036_v3  ;;  %v761_v11 = vadd.f32 %v760_v25, %v591_v8  ;;  %1196 = vst.msk [vmem:[%s2564_s4 + $0xac] sm:$0xf] %vm1152_vm3, %v1131_v6  ;;  %v936_v44 = vmul.f32 %v1942_v5, %v839_v7 }
 0x109   :  { %1165 = vst.msk [vmem:[%s2564_s4 + $0x30] sm:$0xf] %vm1152_vm3, %v1100_v9  ;;  %v905_v42 = vmul.f32 %v1942_v5, %v761_v11  ;;  %v1004_v17 = vadd.f32 %v1948_v10, %v936_v44 }
 0x10a   :  { %v850_v38 = vpop.f32.mrf.mxu3 }
 0x10b   :  { %v973_v21 = vadd.f32 %v1948_v10, %v905_v42  ;;  %v1068_v25 = vmax.f32 %v1004_v17, 0.0 }
 0x10c   :  { %v768_v43 = vpop.f32.mrf.mxu1  ;;  %v671_v29 = vpop.f32.mrf.mxu2 }
 0x10d   :  { %v1037_v27 = vmax.f32 %v973_v21, 0.0  ;;  %v1132_v31 = vpack.c.bf16 %v1068_v25, %v1068_v25  ;;  %v841_v32 = vadd.f32 %v2195_v2, %v671_v29 }
 0x10e   :  { %v594_v33 = vpop.f32.mrf.mxu0 }
 0x10f   :  { %1529 = vmatmul.msk.bf16.gmra.mxu1 %vm446_vm2, %v1356_v18  ;;  %v1101_v12 = vpack.c.bf16 %v1037_v27, %v1037_v27  ;;  %v764_v36 = vadd.f32 %v763_v46, %v594_v33  ;;  %1197 = vst.msk [vmem:[%s2564_s4 + $0xb0] sm:$0xf] %vm1152_vm3, %v1132_v31  ;;  %v937_v37 = vmul.f32 %v1942_v5, %v841_v32 }
 0x111   :  { %1166 = vst.msk [vmem:[%s2564_s4 + $0x34] sm:$0xf] %vm1152_vm3, %v1101_v12  ;;  %v906_v2 = vmul.f32 %v1942_v5, %v764_v36  ;;  %633 = vmatmul.bf16.gmra.mxu0 %v1344_v30  ;;  %v1005_v62 = vadd.f32 %v1948_v10, %v937_v37  ;;  %713 = vmatmul.bf16.gmra.mxu2 %v1472_v34 }
 0x112   :  { %v853_v56 = vpop.f32.mrf.mxu3 }
 0x113   :  { %v974_v39 = vadd.f32 %v1948_v10, %v906_v2  ;;  %v1069_v61 = vmax.f32 %v1005_v62, 0.0 }
 0x114   :  { %v770_v40 = vpop.f32.mrf.mxu1  ;;  %v674_v45 = vpop.f32.mrf.mxu2 }
 0x115   :  { %v1038_v41 = vmax.f32 %v974_v39, 0.0  ;;  %v1133_v46 = vpack.c.bf16 %v1069_v61, %v1069_v61  ;;  %v844_v47 = vadd.f32 %v2219_v26, %v674_v45 }
 0x116   :  { %v596_v48 = vpop.f32.mrf.mxu0 }
 0x117   :  { %v1102_v49 = vpack.c.bf16 %v1038_v41, %v1038_v41  ;;  %v766_v50 = vadd.f32 %v765_v63, %v596_v48  ;;  %1198 = vst.msk [vmem:[%s2564_s4 + $0xb4] sm:$0xf] %vm1152_vm3, %v1133_v46  ;;  %v938_v51 = vmul.f32 %v1942_v5, %v844_v47 }
 0x119   :  { %1167 = vst.msk [vmem:[%s2564_s4 + $0x38] sm:$0xf] %vm1152_vm3, %v1102_v49  ;;  %v907_v52 = vmul.f32 %v1942_v5, %v766_v50  ;;  %v1006_v54 = vadd.f32 %v1948_v10, %v938_v51 }
 0x11a   :  { %v855_v11 = vpop.f32.mrf.mxu3 }
 0x11b   :  { %v975_v26 = vadd.f32 %v1948_v10, %v907_v52  ;;  %v1070_v57 = vmax.f32 %v1006_v54, 0.0 }
 0x11c   :  { %v773_v55 = vpop.f32.mrf.mxu1  ;;  %v676_v58 = vpop.f32.mrf.mxu2 }
 0x11d   :  { %v1039_v20 = vmax.f32 %v975_v26, 0.0  ;;  %v1134_v59 = vpack.c.bf16 %v1070_v57, %v1070_v57  ;;  %v846_v23 = vadd.f32 %v2252_v53, %v676_v58 }
 0x11e   :  { %v599_v28 = vpop.f32.mrf.mxu0 }
 0x11f   :  { %v1103_v60 = vpack.c.bf16 %v1039_v20, %v1039_v20  ;;  %v769_v63 = vadd.f32 %v768_v43, %v599_v28  ;;  %1199 = vst.msk [vmem:[%s2564_s4 + $0xb8] sm:$0xf] %vm1152_vm3, %v1134_v59  ;;  %v939_v1 = vmul.f32 %v1942_v5, %v846_v23 }
 0x121   :  { %1168 = vst.msk [vmem:[%s2564_s4 + $0x3c] sm:$0xf] %vm1152_vm3, %v1103_v60  ;;  %v908_v3 = vmul.f32 %v1942_v5, %v769_v63  ;;  %v1007_v4 = vadd.f32 %v1948_v10, %v939_v1 }
 0x122   :  { %v858_v32 = vpop.f32.mrf.mxu3 }
 0x123   :  { %v976_v53 = vadd.f32 %v1948_v10, %v908_v3  ;;  %v1071_v7 = vmax.f32 %v1007_v4, 0.0 }
 0x124   :  { %v775_v6 = vpop.f32.mrf.mxu1  ;;  %v679_v9 = vpop.f32.mrf.mxu2 }
 0x125   :  { %v1040_v8 = vmax.f32 %v976_v53, 0.0  ;;  %v1135_v13 = vpack.c.bf16 %v1071_v7, %v1071_v7  ;;  %v849_v14 = vadd.f32 %v2275_v15, %v679_v9 }
 0x126   :  { %v601_v44 = vpop.f32.mrf.mxu0 }
 0x127   :  { %v1104_v42 = vpack.c.bf16 %v1040_v8, %v1040_v8  ;;  %v771_v17 = vadd.f32 %v770_v40, %v601_v44  ;;  %1200 = vst.msk [vmem:[%s2564_s4 + $0xbc] sm:$0xf] %vm1152_vm3, %v1135_v13  ;;  %v940_v18 = vmul.f32 %v1942_v5, %v849_v14 }
 0x129   :  { %1169 = vst.msk [vmem:[%s2564_s4 + $0x40] sm:$0xf] %vm1152_vm3, %v1104_v42  ;;  %v909_v0 = vmul.f32 %v1942_v5, %v771_v17  ;;  %v1008_v19 = vadd.f32 %v1948_v10, %v940_v18 }
 0x12a   :  { %v860_v48 = vpop.f32.mrf.mxu3 }
 0x12b   :  { %v977_v15 = vadd.f32 %v1948_v10, %v909_v0  ;;  %v1072_v43 = vmax.f32 %v1008_v19, 0.0 }
 0x12c   :  { %v778_v21 = vpop.f32.mrf.mxu1  ;;  %v681_v24 = vpop.f32.mrf.mxu2 }
 0x12d   :  { %v1041_v22 = vmax.f32 %v977_v15, 0.0  ;;  %v1136_v25 = vpack.c.bf16 %v1072_v43, %v1072_v43  ;;  %v851_v27 = vadd.f32 %v850_v38, %v681_v24 }
 0x12e   :  { %v604_v29 = vpop.f32.mrf.mxu0 }
 0x12f   :  { %v1105_v30 = vpack.c.bf16 %v1041_v22, %v1041_v22  ;;  %v774_v31 = vadd.f32 %v773_v55, %v604_v29  ;;  %1201 = vst.msk [vmem:[%s2564_s4 + $0xc0] sm:$0xf] %vm1152_vm3, %v1136_v25  ;;  %v941_v33 = vmul.f32 %v1942_v5, %v851_v27 }
 0x131   :  { %1170 = vst.msk [vmem:[%s2564_s4 + $0x44] sm:$0xf] %vm1152_vm3, %v1105_v30  ;;  %v910_v34 = vmul.f32 %v1942_v5, %v774_v31  ;;  %v1009_v12 = vadd.f32 %v1948_v10, %v941_v33 }
 0x132   :  { %v863_v1 = vpop.f32.mrf.mxu3 }
 0x133   :  { %v978_v36 = vadd.f32 %v1948_v10, %v910_v34  ;;  %v1073_v2 = vmax.f32 %v1009_v12, 0.0 }
 0x134   :  { %v780_v37 = vpop.f32.mrf.mxu1  ;;  %v684_v62 = vpop.f32.mrf.mxu2 }
 0x135   :  { %v1042_v38 = vmax.f32 %v978_v36, 0.0  ;;  %v1137_v39 = vpack.c.bf16 %v1073_v2, %v1073_v2  ;;  %v854_v40 = vadd.f32 %v853_v56, %v684_v62 }
 0x136   :  { %v606_v61 = vpop.f32.mrf.mxu0 }
 0x137   :  { %v1106_v41 = vpack.c.bf16 %v1042_v38, %v1042_v38  ;;  %v776_v45 = vadd.f32 %v775_v6, %v606_v61  ;;  %1202 = vst.msk [vmem:[%s2564_s4 + $0xc4] sm:$0xf] %vm1152_vm3, %v1137_v39  ;;  %v942_v46 = vmul.f32 %v1942_v5, %v854_v40 }
 0x139   :  { %1171 = vst.msk [vmem:[%s2564_s4 + $0x48] sm:$0xf] %vm1152_vm3, %v1106_v41  ;;  %v911_v47 = vmul.f32 %v1942_v5, %v776_v45  ;;  %v1010_v49 = vadd.f32 %v1948_v10, %v942_v46 }
 0x13a   :  { %v865_v15 = vpop.f32.mrf.mxu3 }
 0x13b   :  { %v979_v50 = vadd.f32 %v1948_v10, %v911_v47  ;;  %v1074_v52 = vmax.f32 %v1010_v49, 0.0 }
 0x13c   :  { %v783_v51 = vpop.f32.mrf.mxu1  ;;  %v686_v26 = vpop.f32.mrf.mxu2 }
 0x13d   :  { %v1043_v54 = vmax.f32 %v979_v50, 0.0  ;;  %v1138_v55 = vpack.c.bf16 %v1074_v52, %v1074_v52  ;;  %v856_v56 = vadd.f32 %v855_v11, %v686_v26 }
 0x13e   :  { %v609_v57 = vpop.f32.mrf.mxu0 }
 0x13f   :  { %v1107_v20 = vpack.c.bf16 %v1043_v54, %v1043_v54  ;;  %v779_v58 = vadd.f32 %v778_v21, %v609_v57  ;;  %1203 = vst.msk [vmem:[%s2564_s4 + $0xc8] sm:$0xf] %vm1152_vm3, %v1138_v55  ;;  %v943_v59 = vmul.f32 %v1942_v5, %v856_v56 }
 0x141   :  { %1172 = vst.msk [vmem:[%s2564_s4 + $0x4c] sm:$0xf] %vm1152_vm3, %v1107_v20  ;;  %v912_v23 = vmul.f32 %v1942_v5, %v779_v58  ;;  %v1011_v28 = vadd.f32 %v1948_v10, %v943_v59 }
 0x142   :  { %v868_v39 = vpop.f32.mrf.mxu3 }
 0x143   :  { %v980_v60 = vadd.f32 %v1948_v10, %v912_v23  ;;  %v1075_v3 = vmax.f32 %v1011_v28, 0.0 }
 0x144   :  { %v785_v63 = vpop.f32.mrf.mxu1  ;;  %v689_v53 = vpop.f32.mrf.mxu2 }
 0x145   :  { %v1044_v4 = vmax.f32 %v980_v60, 0.0  ;;  %v1139_v6 = vpack.c.bf16 %v1075_v3, %v1075_v3  ;;  %v859_v7 = vadd.f32 %v858_v32, %v689_v53 }
 0x146   :  { %v611_v8 = vpop.f32.mrf.mxu0 }
 0x147   :  { %v1108_v9 = vpack.c.bf16 %v1044_v4, %v1044_v4  ;;  %v781_v11 = vadd.f32 %v780_v37, %v611_v8  ;;  %1204 = vst.msk [vmem:[%s2564_s4 + $0xcc] sm:$0xf] %vm1152_vm3, %v1139_v6  ;;  %v944_v13 = vmul.f32 %v1942_v5, %v859_v7 }
 0x149   :  { %1173 = vst.msk [vmem:[%s2564_s4 + $0x50] sm:$0xf] %vm1152_vm3, %v1108_v9  ;;  %v913_v14 = vmul.f32 %v1942_v5, %v781_v11  ;;  %v1012_v44 = vadd.f32 %v1948_v10, %v944_v13 }
 0x14a   :  { %v870_v57 = vpop.f32.mrf.mxu3 }
 0x14b   :  { %v981_v42 = vadd.f32 %v1948_v10, %v913_v14  ;;  %v1076_v18 = vmax.f32 %v1012_v44, 0.0 }
 0x14c   :  { %v788_v17 = vpop.f32.mrf.mxu1  ;;  %v691_v19 = vpop.f32.mrf.mxu2 }
 0x14d   :  { %v1045_v0 = vmax.f32 %v981_v42, 0.0  ;;  %v1140_v21 = vpack.c.bf16 %v1076_v18, %v1076_v18  ;;  %v861_v43 = vadd.f32 %v860_v48, %v691_v19 }
 0x14e   :  { %v614_v22 = vpop.f32.mrf.mxu0 }
 0x14f   :  { %v1109_v24 = vpack.c.bf16 %v1045_v0, %v1045_v0  ;;  %v784_v25 = vadd.f32 %v783_v51, %v614_v22  ;;  %1205 = vst.msk [vmem:[%s2564_s4 + $0xd0] sm:$0xf] %vm1152_vm3, %v1140_v21  ;;  %v945_v27 = vmul.f32 %v1942_v5, %v861_v43  ;;  %v2462_v43 = vld [vmem:[%s2562_s2] ss:$0 sm:$0xff] }
 0x151   :  { %1174 = vst.msk [vmem:[%s2564_s4 + $0x54] sm:$0xf] %vm1152_vm3, %v1109_v24  ;;  %v914_v29 = vmul.f32 %v1942_v5, %v784_v25  ;;  %v1013_v30 = vadd.f32 %v1948_v10, %v945_v27 }
 0x152   :  { %v873_v13 = vpop.f32.mrf.mxu3 }
 0x153   :  { %v982_v31 = vadd.f32 %v1948_v10, %v914_v29  ;;  %v1077_v33 = vmax.f32 %v1013_v30, 0.0 }
 0x154   :  { %v790_v32 = vpop.f32.mrf.mxu1  ;;  %v694_v12 = vpop.f32.mrf.mxu2 }
 0x155   :  { %v1046_v34 = vmax.f32 %v982_v31, 0.0  ;;  %v1141_v36 = vpack.c.bf16 %v1077_v33, %v1077_v33  ;;  %v864_v37 = vadd.f32 %v863_v1, %v694_v12 }
 0x156   :  { %v616_v2 = vpop.f32.mrf.mxu0 }
 0x157   :  { %v1110_v38 = vpack.c.bf16 %v1046_v34, %v1046_v34  ;;  %v786_v62 = vadd.f32 %v785_v63, %v616_v2  ;;  %1206 = vst.msk [vmem:[%s2564_s4 + $0xd4] sm:$0xf] %vm1152_vm3, %v1141_v36  ;;  %v946_v40 = vmul.f32 %v1942_v5, %v864_v37  ;;  %v2480_v2 = vld [vmem:[%s2563_s3] ss:$0 sm:$0xff] }
 0x159   :  { %1175 = vst.msk [vmem:[%s2564_s4 + $0x58] sm:$0xf] %vm1152_vm3, %v1110_v38  ;;  %v915_v61 = vmul.f32 %v1942_v5, %v786_v62  ;;  %v1014_v41 = vadd.f32 %v1948_v10, %v946_v40 }
 0x15a   :  { %v875_v31 = vpop.f32.mrf.mxu3 }
 0x15b   :  { %v983_v45 = vadd.f32 %v1948_v10, %v915_v61  ;;  %v1078_v47 = vmax.f32 %v1014_v41, 0.0 }
 0x15c   :  { %v793_v46 = vpop.f32.mrf.mxu1  ;;  %v696_v49 = vpop.f32.mrf.mxu2 }
 0x15d   :  { %v1047_v48 = vmax.f32 %v983_v45, 0.0  ;;  %v1142_v50 = vpack.c.bf16 %v1078_v47, %v1078_v47  ;;  %v866_v51 = vadd.f32 %v865_v15, %v696_v49 }
 0x15e   :  { %v619_v52 = vpop.f32.mrf.mxu0 }
 0x15f   :  { %v1111_v54 = vpack.c.bf16 %v1047_v48, %v1047_v48  ;;  %v789_v26 = vadd.f32 %v788_v17, %v619_v52  ;;  %1207 = vst.msk [vmem:[%s2564_s4 + $0xd8] sm:$0xf] %vm1152_vm3, %v1142_v50  ;;  %v947_v55 = vmul.f32 %v1942_v5, %v866_v51 }
 0x161   :  { %1176 = vst.msk [vmem:[%s2564_s4 + $0x5c] sm:$0xf] %vm1152_vm3, %v1111_v54  ;;  %v916_v56 = vmul.f32 %v1942_v5, %v789_v26  ;;  %v1015_v20 = vadd.f32 %v1948_v10, %v947_v55 }
 0x162   :  { %v878_v49 = vpop.f32.mrf.mxu3 }
 0x163   :  { %v984_v58 = vadd.f32 %v1948_v10, %v916_v56  ;;  %v1079_v23 = vmax.f32 %v1015_v20, 0.0 }
 0x164   :  { %v795_v59 = vpop.f32.mrf.mxu1  ;;  %v699_v60 = vpop.f32.mrf.mxu2 }
 0x165   :  { %v1048_v28 = vmax.f32 %v984_v58, 0.0  ;;  %v1143_v63 = vpack.c.bf16 %v1079_v23, %v1079_v23  ;;  %v869_v1 = vadd.f32 %v868_v39, %v699_v60 }
 0x166   :  { %v621_v3 = vpop.f32.mrf.mxu0 }
 0x167   :  { %v1112_v4 = vpack.c.bf16 %v1048_v28, %v1048_v28  ;;  %v791_v53 = vadd.f32 %v790_v32, %v621_v3  ;;  %1208 = vst.msk [vmem:[%s2564_s4 + $0xdc] sm:$0xf] %vm1152_vm3, %v1143_v63  ;;  %v948_v6 = vmul.f32 %v1942_v5, %v869_v1 }
 0x169   :  { %1177 = vst.msk [vmem:[%s2564_s4 + $0x60] sm:$0xf] %vm1152_vm3, %v1112_v4  ;;  %v917_v7 = vmul.f32 %v1942_v5, %v791_v53  ;;  %v1016_v8 = vadd.f32 %v1948_v10, %v948_v6 }
 0x16a   :  { %v880_v1 = vpop.f32.mrf.mxu3 }
 0x16b   :  { %v985_v9 = vadd.f32 %v1948_v10, %v917_v7  ;;  %v1080_v14 = vmax.f32 %v1016_v8, 0.0 }
 0x16c   :  { %v798_v11 = vpop.f32.mrf.mxu1  ;;  %v701_v42 = vpop.f32.mrf.mxu2 }
 0x16d   :  { %v1049_v44 = vmax.f32 %v985_v9, 0.0  ;;  %v1144_v17 = vpack.c.bf16 %v1080_v14, %v1080_v14  ;;  %v871_v18 = vadd.f32 %v870_v57, %v701_v42 }
 0x16e   :  { %v624_v0 = vpop.f32.mrf.mxu0 }
 0x16f   :  { %v1113_v19 = vpack.c.bf16 %v1049_v44, %v1049_v44  ;;  %v794_v15 = vadd.f32 %v793_v46, %v624_v0  ;;  %1209 = vst.msk [vmem:[%s2564_s4 + $0xe0] sm:$0xf] %vm1152_vm3, %v1144_v17  ;;  %v949_v21 = vmul.f32 %v1942_v5, %v871_v18 }
 0x171   :  { %1178 = vst.msk [vmem:[%s2564_s4 + $0x64] sm:$0xf] %vm1152_vm3, %v1113_v19  ;;  %v918_v22 = vmul.f32 %v2462_v43, %v794_v15  ;;  %v1017_v24 = vadd.f32 %v1948_v10, %v949_v21 }
 0x173   :  { %v986_v25 = vadd.f32 %v1948_v10, %v918_v22  ;;  %v1081_v29 = vmax.f32 %v1017_v24, 0.0  ;;  %v883_v22 = vpop.f32.mrf.mxu3 }
 0x174   :  { %v800_v27 = vpop.f32.mrf.mxu1  ;;  %v704_v5 = vpop.f32.mrf.mxu2 }
 0x175   :  { %v1050_v30 = vmax.f32 %v986_v25, 0.0  ;;  %v1145_v32 = vpack.c.bf16 %v1081_v29, %v1081_v29  ;;  %v874_v33 = vadd.f32 %v873_v13, %v704_v5 }
 0x176   :  { %v626_v34 = vpop.f32.mrf.mxu0 }
 0x177   :  { %v1114_v12 = vpack.c.bf16 %v1050_v30, %v1050_v30  ;;  %v796_v36 = vadd.f32 %v795_v59, %v626_v34  ;;  %1210 = vst.msk [vmem:[%s2564_s4 + $0xe4] sm:$0xf] %vm1152_vm3, %v1145_v32  ;;  %v950_v37 = vmul.f32 %v2462_v43, %v874_v33 }
 0x179   :  { %1179 = vst.msk [vmem:[%s2564_s4 + $0x68] sm:$0xf] %vm1152_vm3, %v1114_v12  ;;  %v919_v10 = vmul.f32 %v2462_v43, %v796_v36  ;;  %v1018_v38 = vadd.f32 %v2480_v2, %v950_v37 }
 0x17b   :  { %v987_v62 = vadd.f32 %v2480_v2, %v919_v10  ;;  %v1082_v40 = vmax.f32 %v1018_v38, 0.0 }
 0x17c   :  { %v803_v39 = vpop.f32.mrf.mxu1  ;;  %v706_v41 = vpop.f32.mrf.mxu2 }
 0x17d   :  { %v1051_v61 = vmax.f32 %v987_v62, 0.0  ;;  %v1146_v45 = vpack.c.bf16 %v1082_v40, %v1082_v40  ;;  %v876_v46 = vadd.f32 %v875_v31, %v706_v41 }
 0x17e   :  { %v629_v47 = vpop.f32.mrf.mxu0 }
 0x17f   :  { %v1115_v48 = vpack.c.bf16 %v1051_v61, %v1051_v61  ;;  %v799_v50 = vadd.f32 %v798_v11, %v629_v47  ;;  %1211 = vst.msk [vmem:[%s2564_s4 + $0xe8] sm:$0xf] %vm1152_vm3, %v1146_v45  ;;  %v951_v51 = vmul.f32 %v2462_v43, %v876_v46  ;;  %v885_v45 = vpop.f32.mrf.mxu3 }
 0x181   :  { %1180 = vst.msk [vmem:[%s2564_s4 + $0x6c] sm:$0xf] %vm1152_vm3, %v1115_v48  ;;  %v920_v52 = vmul.f32 %v2462_v43, %v799_v50  ;;  %v1019_v54 = vadd.f32 %v2480_v2, %v951_v51 }
 0x183   :  { %v988_v26 = vadd.f32 %v2480_v2, %v920_v52  ;;  %v1083_v56 = vmax.f32 %v1019_v54, 0.0 }
 0x184   :  { %v805_v55 = vpop.f32.mrf.mxu1  ;;  %v709_v20 = vpop.f32.mrf.mxu2 }
 0x185   :  { %v1052_v57 = vmax.f32 %v988_v26, 0.0  ;;  %v1147_v58 = vpack.c.bf16 %v1083_v56, %v1083_v56  ;;  %v879_v59 = vadd.f32 %v878_v49, %v709_v20 }
 0x186   :  { %v631_v23 = vpop.f32.mrf.mxu0 }
 0x187   :  { %v1116_v28 = vpack.c.bf16 %v1052_v57, %v1052_v57  ;;  %v801_v60 = vadd.f32 %v800_v27, %v631_v23  ;;  %1212 = vst.msk [vmem:[%s2564_s4 + $0xec] sm:$0xf] %vm1152_vm3, %v1147_v58  ;;  %v952_v63 = vmul.f32 %v2462_v43, %v879_v59 }
 0x189   :  { %1181 = vst.msk [vmem:[%s2564_s4 + $0x70] sm:$0xf] %vm1152_vm3, %v1116_v28  ;;  %v921_v3 = vmul.f32 %v2462_v43, %v801_v60  ;;  %v1020_v4 = vadd.f32 %v2480_v2, %v952_v63 }
 0x18b   :  { %v989_v53 = vadd.f32 %v2480_v2, %v921_v3  ;;  %v1084_v7 = vmax.f32 %v1020_v4, 0.0 }
 0x18c   :  { %v808_v6 = vpop.f32.mrf.mxu1  ;;  %v711_v11 = vpop.f32.mrf.mxu2 }
 0x18d   :  { %v809_v8 = vadd.f32 %v808_v6, %v1955_v16  ;;  %v1053_v9 = vmax.f32 %v989_v53, 0.0  ;;  %v1148_v13 = vpack.c.bf16 %v1084_v7, %v1084_v7  ;;  %v881_v44 = vadd.f32 %v880_v1, %v711_v11 }
 0x18e   :  { %v634_v42 = vpop.f32.mrf.mxu0 }
 0x18f   :  { %v924_v14 = vmul.f32 %v2462_v43, %v809_v8  ;;  %v1117_v17 = vpack.c.bf16 %v1053_v9, %v1053_v9  ;;  %v804_v18 = vadd.f32 %v803_v39, %v634_v42  ;;  %1213 = vst.msk [vmem:[%s2564_s4 + $0xf0] sm:$0xf] %vm1152_vm3, %v1148_v13  ;;  %v953_v19 = vmul.f32 %v2462_v43, %v881_v44 }
 0x191   :  { %v992_v0 = vadd.f32 %v2480_v2, %v924_v14  ;;  %1182 = vst.msk [vmem:[%s2564_s4 + $0x74] sm:$0xf] %vm1152_vm3, %v1117_v17  ;;  %v922_v16 = vmul.f32 %v2462_v43, %v804_v18  ;;  %v1021_v21 = vadd.f32 %v2480_v2, %v953_v19 }
 0x193   :  { %v1056_v15 = vmax.f32 %v992_v0, 0.0  ;;  %v990_v24 = vadd.f32 %v2480_v2, %v922_v16  ;;  %v1085_v29 = vmax.f32 %v1021_v21, 0.0 }
 0x194   :  { %v810_v25 = vpop.f32.mrf.mxu1  ;;  %v714_v31 = vpop.f32.mrf.mxu2 }
 0x195   :  { %v1120_v27 = vpack.c.bf16 %v1056_v15, %v1056_v15  ;;  %v811_v30 = vadd.f32 %v810_v25, %v1989_v35  ;;  %v1054_v5 = vmax.f32 %v990_v24, 0.0  ;;  %v1149_v32 = vpack.c.bf16 %v1085_v29, %v1085_v29 }
 0x196   :  { %v884_v34 = vadd.f32 %v883_v22, %v714_v31  ;;  %v636_v12 = vpop.f32.mrf.mxu0 }
 0x197   :  { %1185 = vst.msk [vmem:[%s2564_s4 + $0x80] sm:$0xf] %vm1152_vm3, %v1120_v27  ;;  %v925_v33 = vmul.f32 %v2462_v43, %v811_v30  ;;  %v1118_v36 = vpack.c.bf16 %v1054_v5, %v1054_v5  ;;  %v806_v37 = vadd.f32 %v805_v55, %v636_v12 }
 0x198   :  { %1214 = vst.msk [vmem:[%s2564_s4 + $0xf4] sm:$0xf] %vm1152_vm3, %v1149_v32  ;;  %v954_v10 = vmul.f32 %v2462_v43, %v884_v34 }
 0x199   :  { %v993_v35 = vadd.f32 %v2480_v2, %v925_v33  ;;  %1183 = vst.msk [vmem:[%s2564_s4 + $0x78] sm:$0xf] %vm1152_vm3, %v1118_v36  ;;  %v923_v38 = vmul.f32 %v2462_v43, %v806_v37 }
 0x19a   :  { %v1022_v39 = vadd.f32 %v2480_v2, %v954_v10 }
 0x19b   :  { %v1057_v62 = vmax.f32 %v993_v35, 0.0  ;;  %v991_v40 = vadd.f32 %v2480_v2, %v923_v38 }
 0x19c   :  { %v1086_v41 = vmax.f32 %v1022_v39, 0.0  ;;  %v716_v47 = vpop.f32.mrf.mxu2 }
 0x19d   :  { %v1121_v61 = vpack.c.bf16 %v1057_v62, %v1057_v62  ;;  %v1055_v46 = vmax.f32 %v991_v40, 0.0  ;;  %v886_v49 = vadd.f32 %v885_v45, %v716_v47 }
 0x19e   :  { %v1150_v48 = vpack.c.bf16 %v1086_v41, %v1086_v41 }
 0x19f   :  { %1186 = vst.msk [vmem:[%s2564_s4 + $0x84] sm:$0xf] %vm1152_vm3, %v1121_v61  ;;  %v1119_v50 = vpack.c.bf16 %v1055_v46, %v1055_v46  ;;  %v955_v51 = vmul.f32 %v2462_v43, %v886_v49 }
 0x1a0   :  { %1215 = vst.msk [vmem:[%s2564_s4 + $0xf8] sm:$0xf] %vm1152_vm3, %v1150_v48 }
 0x1a1   :  { %1184 = vst.msk [vmem:[%s2564_s4 + $0x7c] sm:$0xf] %vm1152_vm3, %v1119_v50  ;;  %v1023_v52 = vadd.f32 %v2480_v2, %v955_v51 }
 0x1a3   :  { %v1087_v54 = vmax.f32 %v1023_v52, 0.0 }
 0x1a5   :  { %v1151_v26 = vpack.c.bf16 %v1087_v54, %v1087_v54 }
 0x1a7   :  { %1216 = vst.msk [vmem:[%s2564_s4 + $0xfc] sm:$0xf] %vm1152_vm3, %v1151_v26 }

</bundles_post_ra>
